<compile_context>
chip_gen: v5e
topology: v5e:2x2
jax: 0.10.0
libtpu: 0.0.40
codegen_flags: <defaults>
</compile_context>

<pallas_src>
import math
import jax
import jax.numpy as jnp
from jax.experimental import pallas as pl
from jax.experimental.pallas import tpu as pltpu  # noqa: F401  (imported for completeness)

# ---- sizes (small, consistent with the module) -------------------------------
B, T, D = 2, 8, 16          # batch, seq len, input_dimension[-1]
A = 32                      # attention_hidden_size
H = 32                      # gru_hidden_size (rnn_ncells)
C = 4                       # n_classes
G = A + D                   # GRU input size (attention_agg == 'concat')
LANES = 128

INV_SQRT10 = 1.0 / math.sqrt(10.0)

# ---- packed weight-slab row offsets (all 8-aligned -> clean sublane-0 slices) --
R_WQKV = 0                  # (D, 3A)  Q|K|V projection, stored transposed
R_WIA = R_WQKV + D          # (A, 3H)  rows of W_ih^T multiplying the attention output
R_WIX = R_WIA + A           # (D, 3H)  rows of W_ih^T multiplying the raw sequence
R_WH = R_WIX + D            # (H, 3H)  W_hh^T
R_WCLS = R_WH + H           # (H, C)   classifier weight
R_BQKV = 128                # (1, 3A)
R_BI = 136                  # (1, 3H)  b_ih with b_hh's r/z parts folded in
R_BHN = 144                 # (1, H)   b_hh n-gate part (must stay inside r*(...))
R_BCLS = 152                # (1, C)
W_ROWS = 160

# ---- lane-dense output-slab layout --------------------------------------------
# rows [0, B*T): cols [0,G)    -> concat([attn_out, sequences]) flattened to (B*T, G)
#                cols [G,G+T)  -> attention weights flattened to (B*T, T)
# rows [B*T, B*T+B): cols [0,H)     -> final (mean) RNN state
#                    cols [H,H+C)   -> log-probs
O_ROWS = B * T + B          # 18


# ---- fused kernel: kqv attention + concat + GRU + mean + classifier ----------
def fused_attention_rnn_kernel(seq_ref, w_ref, out_ref):
    # ---- attention (kqv), whole batch in one MXU pass ----
    x = seq_ref[...]                                              # (B, T, D)
    x2 = x.reshape(B * T, D)                                      # free sublane-merge reshape

    wqkv = w_ref[R_WQKV:R_WQKV + D, 0:3 * A]                      # (D, 3A)
    bqkv = w_ref[R_BQKV:R_BQKV + 1, 0:3 * A]                      # (1, 3A)
    qkv = jnp.dot(x2, wqkv, preferred_element_type=jnp.float32) + bqkv   # (B*T, 3A)

    q = qkv[:, 0 * A:1 * A].reshape(B, T, A)
    k = qkv[:, 1 * A:2 * A].reshape(B, T, A)
    v = qkv[:, 2 * A:3 * A].reshape(B, T, A)

    # scores = Q K^T / sqrt(10); scale folded into Q (cheaper than scaling (B,T,T))
    qs = q * INV_SQRT10
    scores = jnp.einsum("bqd,bkd->bqk", qs, k,
                        preferred_element_type=jnp.float32)       # (B, T, T)
    m = jnp.max(scores, axis=-1, keepdims=True)
    e = jnp.exp(scores - m)
    aw = e / jnp.sum(e, axis=-1, keepdims=True)                   # softmax(dim=-1)
    ao = jnp.einsum("bqk,bkd->bqd", aw, v,
                    preferred_element_type=jnp.float32)           # (B, T, A)

    ao2 = ao.reshape(B * T, A)
    aw2 = aw.reshape(B * T, T)

    # ---- GRU input projection, hoisted out of the recurrence ----
    # No lane-concat: concat([ao, x]) @ W_ih^T  ==  ao @ W_ih^T[:A] + x @ W_ih^T[A:]
    wi_a = w_ref[R_WIA:R_WIA + A, 0:3 * H]                        # (A, 3H)
    wi_x = w_ref[R_WIX:R_WIX + D, 0:3 * H]                        # (D, 3H)
    bi = w_ref[R_BI:R_BI + 1, 0:3 * H]                            # (1, 3H) (b_hh r/z folded in)
    xg = (jnp.dot(ao2, wi_a, preferred_element_type=jnp.float32)
          + jnp.dot(x2, wi_x, preferred_element_type=jnp.float32)
          + bi).reshape(B, T, 3 * H)                              # (B, T, 3H)

    wh = w_ref[R_WH:R_WH + H, 0:3 * H]                            # (H, 3H)
    # hoisted out of the loop: JAX does not CSE broadcast_in_dim
    bhn = jnp.broadcast_to(w_ref[R_BHN:R_BHN + 1, 0:H], (B, H))   # (B, H)

    h = jnp.zeros((B, H), jnp.float32)      # self.hidden is None -> zero init
    hsum = jnp.zeros((B, H), jnp.float32)
    # T=8 sequential recurrence, fully unrolled straight-line code (static slices).
    for t in range(T):
        gx = xg[:, t, :]                                          # (B, 3H)
        gh = jnp.dot(h, wh, preferred_element_type=jnp.float32)   # (B, 3H), no bias add
        # r and z share one 64-lane sigmoid (single EUP push per step)
        rz = jax.nn.sigmoid(gx[:, 0:2 * H] + gh[:, 0:2 * H])
        r = rz[:, 0:H]
        z = rz[:, H:2 * H]
        n = jnp.tanh(gx[:, 2 * H:3 * H] + r * (gh[:, 2 * H:3 * H] + bhn))
        h = (1.0 - z) * n + z * h
        hsum = hsum + h

    mean_h = hsum * (1.0 / float(T))                              # torch.mean(rnn_x, 1)

    # ---- classifier + log_softmax ----
    wcls = w_ref[R_WCLS:R_WCLS + H, 0:C]                          # (H, C)
    bcls = w_ref[R_BCLS:R_BCLS + 1, 0:C]                          # (1, C)
    logits = jnp.dot(mean_h, wcls, preferred_element_type=jnp.float32) + bcls
    mmax = jnp.max(logits, axis=-1, keepdims=True)
    lse = mmax + jnp.log(jnp.sum(jnp.exp(logits - mmax), axis=-1, keepdims=True))
    logp = logits - lse                                           # log_softmax(dim=1)

    # ---- single lane-dense output slab: two full-128-lane stores, one HBM DMA ----
    top = jnp.concatenate(
        [ao2, x2, aw2, jnp.zeros((B * T, LANES - G - T), jnp.float32)], axis=-1)  # (B*T, 128)
    out_ref[0:B * T, :] = top
    bot = jnp.concatenate(
        [mean_h, logp, jnp.zeros((B, LANES - H - C), jnp.float32)], axis=-1)      # (B, 128)
    out_ref[B * T:B * T + B, :] = bot


def attention_rnn_forward(params, sequences, lens):
    # lens is unused for rnn_type='agg' (matches the PyTorch module in this config)
    del lens
    out = pl.pallas_call(
        fused_attention_rnn_kernel,
        out_shape=jax.ShapeDtypeStruct((O_ROWS, LANES), jnp.float32),
    )(sequences, params["slab"])
    # unpack the slab in the wrapper
    top = out[:B * T]
    attn_concat = top[:, 0:G].reshape(B, T, G)
    attn_weights = top[:, G:G + T].reshape(B, T, T)
    bot = out[B * T:B * T + B]
    final_state = bot[:, 0:H]
    log_probs = bot[:, H:H + C]
    return log_probs, (attn_concat, attn_weights, final_state)


# ---- parameter init (deterministic, PyTorch-style uniform) --------------------
def init_params(key):
    def uni(k, shape, fan_in):
        bound = 1.0 / math.sqrt(fan_in)
        return jax.random.uniform(k, shape, jnp.float32, -bound, bound)

    ks = jax.random.split(key, 8)
    # attention: Q|K|V packed along the output dim, stored transposed as (in, out)
    wqkv = uni(ks[0], (D, 3 * A), D)
    bqkv = uni(ks[1], (1, 3 * A), D)
    # GRU, gate order [r|z|n], stored transposed as (in, 3H); PyTorch fan = hidden_size
    wi = uni(ks[2], (G, 3 * H), H)   # W_ih^T
    wh = uni(ks[3], (H, 3 * H), H)   # W_hh^T
    bi = uni(ks[4], (1, 3 * H), H)   # b_ih
    bh = uni(ks[5], (1, 3 * H), H)   # b_hh
    # classifier
    wcls = uni(ks[6], (H, C), H)
    bcls = uni(ks[7], (1, C), H)
    raw = dict(attn=(wqkv, bqkv), gru=(wi, wh, bi, bh), cls=(wcls, bcls))
    raw["slab"] = pack_weight_slab(raw)
    return raw


def pack_weight_slab(p):
    """One-time host-side packing of all weights/biases into a (160, 128) f32 slab."""
    wqkv, bqkv = p["attn"]
    wi, wh, bi, bh = p["gru"]
    wcls, bcls = p["cls"]

    def put(s, row, mat):
        r, c = mat.shape
        return s.at[row:row + r, 0:c].set(mat)

    slab = jnp.zeros((W_ROWS, LANES), jnp.float32)
    slab = put(slab, R_WQKV, wqkv)
    slab = put(slab, R_WIA, wi[:A, :])            # rows multiplying the attention output
    slab = put(slab, R_WIX, wi[A:, :])            # rows multiplying the raw sequence
    slab = put(slab, R_WH, wh)
    slab = put(slab, R_WCLS, wcls)
    slab = put(slab, R_BQKV, bqkv)
    # fold b_hh's r/z components into b_ih (mathematically identical for the GRU gates);
    # keep the n-gate b_hh separate because it is scaled by r inside the recurrence.
    bi_fold = bi.at[:, 0:2 * H].add(bh[:, 0:2 * H])
    slab = put(slab, R_BI, bi_fold)
    slab = put(slab, R_BHN, bh[:, 2 * H:3 * H])
    slab = put(slab, R_BCLS, bcls)
    return slab


# ---- pure-JAX reference (for correctness check, uses the UNPACKED params) ------
def reference_forward(params, sequences):
    wqkv, bqkv = params["attn"]
    qkv = sequences @ wqkv + bqkv                        # (B, T, 3A)
    q, k, v = qkv[..., :A], qkv[..., A:2 * A], qkv[..., 2 * A:]
    scores = jnp.einsum("bqd,bkd->bqk", q, k) / math.sqrt(10.0)
    aw = jax.nn.softmax(scores, axis=-1)
    ao = jnp.einsum("bqk,bkd->bqd", aw, v)
    xcat = jnp.concatenate([ao, sequences], axis=2)      # (B, T, G)

    wi, wh, bi, bh = params["gru"]

    def step(h, xt):
        gx = xt @ wi + bi
        gh = h @ wh + bh
        r = jax.nn.sigmoid(gx[:, :H] + gh[:, :H])
        z = jax.nn.sigmoid(gx[:, H:2 * H] + gh[:, H:2 * H])
        n = jnp.tanh(gx[:, 2 * H:] + r * gh[:, 2 * H:])
        h_new = (1.0 - z) * n + z * h
        return h_new, h_new

    h0 = jnp.zeros((B, H), jnp.float32)
    _, hs = jax.lax.scan(step, h0, jnp.transpose(xcat, (1, 0, 2)))
    mean_h = jnp.mean(hs, axis=0)
    wcls, bcls = params["cls"]
    logits = mean_h @ wcls + bcls
    return jax.nn.log_softmax(logits, axis=1), (xcat, aw, mean_h)


if __name__ == "__main__":
    key = jax.random.PRNGKey(0)
    k_seq, k_par = jax.random.split(key)
    sequences = jax.random.normal(k_seq, (B, T, D), jnp.float32)
    lens = jnp.full((B,), T, jnp.int32)                  # unused for rnn_type='agg'
    params = init_params(k_par)

    log_probs, (attn_out, attn_w, final_state) = attention_rnn_forward(params, sequences, lens)
    jax.block_until_ready(log_probs)

    ref_lp, (ref_ao, ref_aw, ref_fs) = reference_forward(params, sequences)
    assert jnp.allclose(log_probs, ref_lp, atol=1e-4, rtol=1e-4)
    assert jnp.allclose(attn_out, ref_ao, atol=1e-4, rtol=1e-4)
    assert jnp.allclose(attn_w, ref_aw, atol=1e-4, rtol=1e-4)
    assert jnp.allclose(final_state, ref_fs, atol=1e-4, rtol=1e-4)

    print("KERNEL_OK")
</pallas_src>

<mosaic_0001>
module attributes {stable_mosaic.version = 11 : i64} {
  func.func @fused_attention_rnn_kernel(%arg0: memref<2x8x16xf32, #tpu.memory_space<vmem>>, %arg1: memref<160x128xf32, #tpu.memory_space<vmem>>, %arg2: memref<18x128xf32, #tpu.memory_space<vmem>>) attributes {dimension_semantics = [], scalar_prefetch = 0 : i64, scratch_operands = 0 : i64, tpu.core_type = #tpu.core_type<tc>} {
    %c0 = arith.constant 0 : index
    %c0_0 = arith.constant 0 : index
    %c0_1 = arith.constant 0 : index
    %0 = vector.load %arg0[%c0, %c0_0, %c0_1] : memref<2x8x16xf32, #tpu.memory_space<vmem>>, vector<2x8x16xf32>
    %1 = vector.shape_cast %0 : vector<2x8x16xf32> to vector<16x16xf32>
    %c0_2 = arith.constant 0 : index
    %c0_3 = arith.constant 0 : index
    %2 = vector.load %arg1[%c0_2, %c0_3] : memref<160x128xf32, #tpu.memory_space<vmem>>, vector<16x96xf32>
    %c128 = arith.constant 128 : index
    %c0_4 = arith.constant 0 : index
    %3 = vector.load %arg1[%c128, %c0_4] : memref<160x128xf32, #tpu.memory_space<vmem>>, vector<1x96xf32>
    %cst = arith.constant dense<0.000000e+00> : vector<16x96xf32>
    %4 = tpu.matmul %1, %2, %cst {dimension_numbers = #tpu.dot_dimension_numbers<[1], [0], [0], [1], [0, 0, 1, 1], [], []>} : vector<16x16xf32>, vector<16x96xf32>, vector<16x96xf32> -> vector<16x96xf32>
    %5 = vector.broadcast %3 : vector<1x96xf32> to vector<16x96xf32>
    %6 = arith.addf %4, %5 : vector<16x96xf32>
    %7 = vector.extract_strided_slice %6 {offsets = [0, 0], sizes = [16, 32], strides = [1, 1]} : vector<16x96xf32> to vector<16x32xf32>
    %8 = vector.shape_cast %7 : vector<16x32xf32> to vector<2x8x32xf32>
    %9 = vector.extract_strided_slice %6 {offsets = [0, 32], sizes = [16, 32], strides = [1, 1]} : vector<16x96xf32> to vector<16x32xf32>
    %10 = vector.shape_cast %9 : vector<16x32xf32> to vector<2x8x32xf32>
    %11 = vector.extract_strided_slice %6 {offsets = [0, 64], sizes = [16, 32], strides = [1, 1]} : vector<16x96xf32> to vector<16x32xf32>
    %12 = vector.shape_cast %11 : vector<16x32xf32> to vector<2x8x32xf32>
    %cst_5 = arith.constant 0.316227764 : f32
    %13 = vector.broadcast %cst_5 : f32 to vector<2x8x32xf32>
    %14 = arith.mulf %8, %13 : vector<2x8x32xf32>
    "tpu.trace_start"() <{level = 10 : i32, message = "bqd,bkd->bqk"}> : () -> ()
    %cst_6 = arith.constant dense<0.000000e+00> : vector<2x8x8xf32>
    %15 = tpu.matmul %14, %10, %cst_6 {dimension_numbers = #tpu.dot_dimension_numbers<[2], [2], [1], [1], [0, 0, 0, 1, 1, 1], [0], [0]>} : vector<2x8x32xf32>, vector<2x8x32xf32>, vector<2x8x8xf32> -> vector<2x8x8xf32>
    "tpu.trace_stop"() : () -> ()
    %cst_7 = arith.constant dense<0xFF800000> : vector<2x8xf32>
    %16 = vector.multi_reduction <maximumf>, %15, %cst_7 [2] : vector<2x8x8xf32> to vector<2x8xf32>
    %17 = vector.shape_cast %16 : vector<2x8xf32> to vector<2x8x1xf32>
    %18 = vector.broadcast %17 : vector<2x8x1xf32> to vector<2x8x8xf32>
    %19 = arith.subf %15, %18 : vector<2x8x8xf32>
    %20 = math.exp %19 : vector<2x8x8xf32>
    %cst_8 = arith.constant dense<0.000000e+00> : vector<2x8xf32>
    %21 = vector.multi_reduction <add>, %20, %cst_8 [2] : vector<2x8x8xf32> to vector<2x8xf32>
    %22 = vector.shape_cast %21 : vector<2x8xf32> to vector<2x8x1xf32>
    %23 = vector.broadcast %22 : vector<2x8x1xf32> to vector<2x8x8xf32>
    %24 = arith.divf %20, %23 : vector<2x8x8xf32>
    "tpu.trace_start"() <{level = 10 : i32, message = "bqk,bkd->bqd"}> : () -> ()
    %cst_9 = arith.constant dense<0.000000e+00> : vector<2x8x32xf32>
    %25 = tpu.matmul %24, %12, %cst_9 {dimension_numbers = #tpu.dot_dimension_numbers<[2], [1], [1], [2], [0, 0, 0, 1, 1, 2], [0], [0]>} : vector<2x8x8xf32>, vector<2x8x32xf32>, vector<2x8x32xf32> -> vector<2x8x32xf32>
    "tpu.trace_stop"() : () -> ()
    %26 = vector.shape_cast %25 : vector<2x8x32xf32> to vector<16x32xf32>
    %27 = vector.shape_cast %24 : vector<2x8x8xf32> to vector<16x8xf32>
    %c16 = arith.constant 16 : index
    %c0_10 = arith.constant 0 : index
    %28 = vector.load %arg1[%c16, %c0_10] : memref<160x128xf32, #tpu.memory_space<vmem>>, vector<32x96xf32>
    %c48 = arith.constant 48 : index
    %c0_11 = arith.constant 0 : index
    %29 = vector.load %arg1[%c48, %c0_11] : memref<160x128xf32, #tpu.memory_space<vmem>>, vector<16x96xf32>
    %c136 = arith.constant 136 : index
    %c0_12 = arith.constant 0 : index
    %30 = vector.load %arg1[%c136, %c0_12] : memref<160x128xf32, #tpu.memory_space<vmem>>, vector<1x96xf32>
    %cst_13 = arith.constant dense<0.000000e+00> : vector<16x96xf32>
    %31 = tpu.matmul %26, %28, %cst_13 {dimension_numbers = #tpu.dot_dimension_numbers<[1], [0], [0], [1], [0, 0, 1, 1], [], []>} : vector<16x32xf32>, vector<32x96xf32>, vector<16x96xf32> -> vector<16x96xf32>
    %cst_14 = arith.constant dense<0.000000e+00> : vector<16x96xf32>
    %32 = tpu.matmul %1, %29, %cst_14 {dimension_numbers = #tpu.dot_dimension_numbers<[1], [0], [0], [1], [0, 0, 1, 1], [], []>} : vector<16x16xf32>, vector<16x96xf32>, vector<16x96xf32> -> vector<16x96xf32>
    %33 = arith.addf %31, %32 : vector<16x96xf32>
    %34 = vector.broadcast %30 : vector<1x96xf32> to vector<16x96xf32>
    %35 = arith.addf %33, %34 : vector<16x96xf32>
    %36 = vector.shape_cast %35 : vector<16x96xf32> to vector<2x8x96xf32>
    %c64 = arith.constant 64 : index
    %c0_15 = arith.constant 0 : index
    %37 = vector.load %arg1[%c64, %c0_15] : memref<160x128xf32, #tpu.memory_space<vmem>>, vector<32x96xf32>
    %c144 = arith.constant 144 : index
    %c0_16 = arith.constant 0 : index
    %38 = vector.load %arg1[%c144, %c0_16] : memref<160x128xf32, #tpu.memory_space<vmem>>, vector<1x32xf32>
    %39 = vector.shape_cast %38 : vector<1x32xf32> to vector<1x32xf32>
    %40 = vector.broadcast %39 : vector<1x32xf32> to vector<2x32xf32>
    %cst_17 = arith.constant 0.000000e+00 : f32
    %41 = vector.broadcast %cst_17 : f32 to vector<2x32xf32>
    %cst_18 = arith.constant 0.000000e+00 : f32
    %42 = vector.broadcast %cst_18 : f32 to vector<2x32xf32>
    %43 = vector.extract_strided_slice %36 {offsets = [0, 0, 0], sizes = [2, 1, 96], strides = [1, 1, 1]} : vector<2x8x96xf32> to vector<2x1x96xf32>
    %44 = vector.shape_cast %43 : vector<2x1x96xf32> to vector<2x96xf32>
    %cst_19 = arith.constant dense<0.000000e+00> : vector<2x96xf32>
    %45 = tpu.matmul %41, %37, %cst_19 {dimension_numbers = #tpu.dot_dimension_numbers<[1], [0], [0], [1], [0, 0, 1, 1], [], []>} : vector<2x32xf32>, vector<32x96xf32>, vector<2x96xf32> -> vector<2x96xf32>
    %46 = vector.extract_strided_slice %44 {offsets = [0, 0], sizes = [2, 64], strides = [1, 1]} : vector<2x96xf32> to vector<2x64xf32>
    %47 = vector.extract_strided_slice %45 {offsets = [0, 0], sizes = [2, 64], strides = [1, 1]} : vector<2x96xf32> to vector<2x64xf32>
    %48 = arith.addf %46, %47 : vector<2x64xf32>
    %49 = arith.negf %48 : vector<2x64xf32>
    %50 = math.exp %49 : vector<2x64xf32>
    %cst_20 = arith.constant 1.000000e+00 : f32
    %51 = vector.broadcast %cst_20 : f32 to vector<2x64xf32>
    %52 = arith.addf %51, %50 : vector<2x64xf32>
    %53 = arith.divf %51, %52 : vector<2x64xf32>
    %54 = vector.extract_strided_slice %53 {offsets = [0, 0], sizes = [2, 32], strides = [1, 1]} : vector<2x64xf32> to vector<2x32xf32>
    %55 = vector.extract_strided_slice %53 {offsets = [0, 32], sizes = [2, 32], strides = [1, 1]} : vector<2x64xf32> to vector<2x32xf32>
    %56 = vector.extract_strided_slice %44 {offsets = [0, 64], sizes = [2, 32], strides = [1, 1]} : vector<2x96xf32> to vector<2x32xf32>
    %57 = vector.extract_strided_slice %45 {offsets = [0, 64], sizes = [2, 32], strides = [1, 1]} : vector<2x96xf32> to vector<2x32xf32>
    %58 = arith.addf %57, %40 : vector<2x32xf32>
    %59 = arith.mulf %54, %58 : vector<2x32xf32>
    %60 = arith.addf %56, %59 : vector<2x32xf32>
    %61 = math.tanh %60 : vector<2x32xf32>
    %cst_21 = arith.constant 1.000000e+00 : f32
    %62 = vector.broadcast %cst_21 : f32 to vector<2x32xf32>
    %63 = arith.subf %62, %55 : vector<2x32xf32>
    %64 = arith.mulf %63, %61 : vector<2x32xf32>
    %65 = arith.mulf %55, %41 : vector<2x32xf32>
    %66 = arith.addf %64, %65 : vector<2x32xf32>
    %67 = arith.addf %42, %66 : vector<2x32xf32>
    %68 = vector.extract_strided_slice %36 {offsets = [0, 1, 0], sizes = [2, 1, 96], strides = [1, 1, 1]} : vector<2x8x96xf32> to vector<2x1x96xf32>
    %69 = vector.shape_cast %68 : vector<2x1x96xf32> to vector<2x96xf32>
    %cst_22 = arith.constant dense<0.000000e+00> : vector<2x96xf32>
    %70 = tpu.matmul %66, %37, %cst_22 {dimension_numbers = #tpu.dot_dimension_numbers<[1], [0], [0], [1], [0, 0, 1, 1], [], []>} : vector<2x32xf32>, vector<32x96xf32>, vector<2x96xf32> -> vector<2x96xf32>
    %71 = vector.extract_strided_slice %69 {offsets = [0, 0], sizes = [2, 64], strides = [1, 1]} : vector<2x96xf32> to vector<2x64xf32>
    %72 = vector.extract_strided_slice %70 {offsets = [0, 0], sizes = [2, 64], strides = [1, 1]} : vector<2x96xf32> to vector<2x64xf32>
    %73 = arith.addf %71, %72 : vector<2x64xf32>
    %74 = arith.negf %73 : vector<2x64xf32>
    %75 = math.exp %74 : vector<2x64xf32>
    %cst_23 = arith.constant 1.000000e+00 : f32
    %76 = vector.broadcast %cst_23 : f32 to vector<2x64xf32>
    %77 = arith.addf %76, %75 : vector<2x64xf32>
    %78 = arith.divf %76, %77 : vector<2x64xf32>
    %79 = vector.extract_strided_slice %78 {offsets = [0, 0], sizes = [2, 32], strides = [1, 1]} : vector<2x64xf32> to vector<2x32xf32>
    %80 = vector.extract_strided_slice %78 {offsets = [0, 32], sizes = [2, 32], strides = [1, 1]} : vector<2x64xf32> to vector<2x32xf32>
    %81 = vector.extract_strided_slice %69 {offsets = [0, 64], sizes = [2, 32], strides = [1, 1]} : vector<2x96xf32> to vector<2x32xf32>
    %82 = vector.extract_strided_slice %70 {offsets = [0, 64], sizes = [2, 32], strides = [1, 1]} : vector<2x96xf32> to vector<2x32xf32>
    %83 = arith.addf %82, %40 : vector<2x32xf32>
    %84 = arith.mulf %79, %83 : vector<2x32xf32>
    %85 = arith.addf %81, %84 : vector<2x32xf32>
    %86 = math.tanh %85 : vector<2x32xf32>
    %cst_24 = arith.constant 1.000000e+00 : f32
    %87 = vector.broadcast %cst_24 : f32 to vector<2x32xf32>
    %88 = arith.subf %87, %80 : vector<2x32xf32>
    %89 = arith.mulf %88, %86 : vector<2x32xf32>
    %90 = arith.mulf %80, %66 : vector<2x32xf32>
    %91 = arith.addf %89, %90 : vector<2x32xf32>
    %92 = arith.addf %67, %91 : vector<2x32xf32>
    %93 = vector.extract_strided_slice %36 {offsets = [0, 2, 0], sizes = [2, 1, 96], strides = [1, 1, 1]} : vector<2x8x96xf32> to vector<2x1x96xf32>
    %94 = vector.shape_cast %93 : vector<2x1x96xf32> to vector<2x96xf32>
    %cst_25 = arith.constant dense<0.000000e+00> : vector<2x96xf32>
    %95 = tpu.matmul %91, %37, %cst_25 {dimension_numbers = #tpu.dot_dimension_numbers<[1], [0], [0], [1], [0, 0, 1, 1], [], []>} : vector<2x32xf32>, vector<32x96xf32>, vector<2x96xf32> -> vector<2x96xf32>
    %96 = vector.extract_strided_slice %94 {offsets = [0, 0], sizes = [2, 64], strides = [1, 1]} : vector<2x96xf32> to vector<2x64xf32>
    %97 = vector.extract_strided_slice %95 {offsets = [0, 0], sizes = [2, 64], strides = [1, 1]} : vector<2x96xf32> to vector<2x64xf32>
    %98 = arith.addf %96, %97 : vector<2x64xf32>
    %99 = arith.negf %98 : vector<2x64xf32>
    %100 = math.exp %99 : vector<2x64xf32>
    %cst_26 = arith.constant 1.000000e+00 : f32
    %101 = vector.broadcast %cst_26 : f32 to vector<2x64xf32>
    %102 = arith.addf %101, %100 : vector<2x64xf32>
    %103 = arith.divf %101, %102 : vector<2x64xf32>
    %104 = vector.extract_strided_slice %103 {offsets = [0, 0], sizes = [2, 32], strides = [1, 1]} : vector<2x64xf32> to vector<2x32xf32>
    %105 = vector.extract_strided_slice %103 {offsets = [0, 32], sizes = [2, 32], strides = [1, 1]} : vector<2x64xf32> to vector<2x32xf32>
    %106 = vector.extract_strided_slice %94 {offsets = [0, 64], sizes = [2, 32], strides = [1, 1]} : vector<2x96xf32> to vector<2x32xf32>
    %107 = vector.extract_strided_slice %95 {offsets = [0, 64], sizes = [2, 32], strides = [1, 1]} : vector<2x96xf32> to vector<2x32xf32>
    %108 = arith.addf %107, %40 : vector<2x32xf32>
    %109 = arith.mulf %104, %108 : vector<2x32xf32>
    %110 = arith.addf %106, %109 : vector<2x32xf32>
    %111 = math.tanh %110 : vector<2x32xf32>
    %cst_27 = arith.constant 1.000000e+00 : f32
    %112 = vector.broadcast %cst_27 : f32 to vector<2x32xf32>
    %113 = arith.subf %112, %105 : vector<2x32xf32>
    %114 = arith.mulf %113, %111 : vector<2x32xf32>
    %115 = arith.mulf %105, %91 : vector<2x32xf32>
    %116 = arith.addf %114, %115 : vector<2x32xf32>
    %117 = arith.addf %92, %116 : vector<2x32xf32>
    %118 = vector.extract_strided_slice %36 {offsets = [0, 3, 0], sizes = [2, 1, 96], strides = [1, 1, 1]} : vector<2x8x96xf32> to vector<2x1x96xf32>
    %119 = vector.shape_cast %118 : vector<2x1x96xf32> to vector<2x96xf32>
    %cst_28 = arith.constant dense<0.000000e+00> : vector<2x96xf32>
    %120 = tpu.matmul %116, %37, %cst_28 {dimension_numbers = #tpu.dot_dimension_numbers<[1], [0], [0], [1], [0, 0, 1, 1], [], []>} : vector<2x32xf32>, vector<32x96xf32>, vector<2x96xf32> -> vector<2x96xf32>
    %121 = vector.extract_strided_slice %119 {offsets = [0, 0], sizes = [2, 64], strides = [1, 1]} : vector<2x96xf32> to vector<2x64xf32>
    %122 = vector.extract_strided_slice %120 {offsets = [0, 0], sizes = [2, 64], strides = [1, 1]} : vector<2x96xf32> to vector<2x64xf32>
    %123 = arith.addf %121, %122 : vector<2x64xf32>
    %124 = arith.negf %123 : vector<2x64xf32>
    %125 = math.exp %124 : vector<2x64xf32>
    %cst_29 = arith.constant 1.000000e+00 : f32
    %126 = vector.broadcast %cst_29 : f32 to vector<2x64xf32>
    %127 = arith.addf %126, %125 : vector<2x64xf32>
    %128 = arith.divf %126, %127 : vector<2x64xf32>
    %129 = vector.extract_strided_slice %128 {offsets = [0, 0], sizes = [2, 32], strides = [1, 1]} : vector<2x64xf32> to vector<2x32xf32>
    %130 = vector.extract_strided_slice %128 {offsets = [0, 32], sizes = [2, 32], strides = [1, 1]} : vector<2x64xf32> to vector<2x32xf32>
    %131 = vector.extract_strided_slice %119 {offsets = [0, 64], sizes = [2, 32], strides = [1, 1]} : vector<2x96xf32> to vector<2x32xf32>
    %132 = vector.extract_strided_slice %120 {offsets = [0, 64], sizes = [2, 32], strides = [1, 1]} : vector<2x96xf32> to vector<2x32xf32>
    %133 = arith.addf %132, %40 : vector<2x32xf32>
    %134 = arith.mulf %129, %133 : vector<2x32xf32>
    %135 = arith.addf %131, %134 : vector<2x32xf32>
    %136 = math.tanh %135 : vector<2x32xf32>
    %cst_30 = arith.constant 1.000000e+00 : f32
    %137 = vector.broadcast %cst_30 : f32 to vector<2x32xf32>
    %138 = arith.subf %137, %130 : vector<2x32xf32>
    %139 = arith.mulf %138, %136 : vector<2x32xf32>
    %140 = arith.mulf %130, %116 : vector<2x32xf32>
    %141 = arith.addf %139, %140 : vector<2x32xf32>
    %142 = arith.addf %117, %141 : vector<2x32xf32>
    %143 = vector.extract_strided_slice %36 {offsets = [0, 4, 0], sizes = [2, 1, 96], strides = [1, 1, 1]} : vector<2x8x96xf32> to vector<2x1x96xf32>
    %144 = vector.shape_cast %143 : vector<2x1x96xf32> to vector<2x96xf32>
    %cst_31 = arith.constant dense<0.000000e+00> : vector<2x96xf32>
    %145 = tpu.matmul %141, %37, %cst_31 {dimension_numbers = #tpu.dot_dimension_numbers<[1], [0], [0], [1], [0, 0, 1, 1], [], []>} : vector<2x32xf32>, vector<32x96xf32>, vector<2x96xf32> -> vector<2x96xf32>
    %146 = vector.extract_strided_slice %144 {offsets = [0, 0], sizes = [2, 64], strides = [1, 1]} : vector<2x96xf32> to vector<2x64xf32>
    %147 = vector.extract_strided_slice %145 {offsets = [0, 0], sizes = [2, 64], strides = [1, 1]} : vector<2x96xf32> to vector<2x64xf32>
    %148 = arith.addf %146, %147 : vector<2x64xf32>
    %149 = arith.negf %148 : vector<2x64xf32>
    %150 = math.exp %149 : vector<2x64xf32>
    %cst_32 = arith.constant 1.000000e+00 : f32
    %151 = vector.broadcast %cst_32 : f32 to vector<2x64xf32>
    %152 = arith.addf %151, %150 : vector<2x64xf32>
    %153 = arith.divf %151, %152 : vector<2x64xf32>
    %154 = vector.extract_strided_slice %153 {offsets = [0, 0], sizes = [2, 32], strides = [1, 1]} : vector<2x64xf32> to vector<2x32xf32>
    %155 = vector.extract_strided_slice %153 {offsets = [0, 32], sizes = [2, 32], strides = [1, 1]} : vector<2x64xf32> to vector<2x32xf32>
    %156 = vector.extract_strided_slice %144 {offsets = [0, 64], sizes = [2, 32], strides = [1, 1]} : vector<2x96xf32> to vector<2x32xf32>
    %157 = vector.extract_strided_slice %145 {offsets = [0, 64], sizes = [2, 32], strides = [1, 1]} : vector<2x96xf32> to vector<2x32xf32>
    %158 = arith.addf %157, %40 : vector<2x32xf32>
    %159 = arith.mulf %154, %158 : vector<2x32xf32>
    %160 = arith.addf %156, %159 : vector<2x32xf32>
    %161 = math.tanh %160 : vector<2x32xf32>
    %cst_33 = arith.constant 1.000000e+00 : f32
    %162 = vector.broadcast %cst_33 : f32 to vector<2x32xf32>
    %163 = arith.subf %162, %155 : vector<2x32xf32>
    %164 = arith.mulf %163, %161 : vector<2x32xf32>
    %165 = arith.mulf %155, %141 : vector<2x32xf32>
    %166 = arith.addf %164, %165 : vector<2x32xf32>
    %167 = arith.addf %142, %166 : vector<2x32xf32>
    %168 = vector.extract_strided_slice %36 {offsets = [0, 5, 0], sizes = [2, 1, 96], strides = [1, 1, 1]} : vector<2x8x96xf32> to vector<2x1x96xf32>
    %169 = vector.shape_cast %168 : vector<2x1x96xf32> to vector<2x96xf32>
    %cst_34 = arith.constant dense<0.000000e+00> : vector<2x96xf32>
    %170 = tpu.matmul %166, %37, %cst_34 {dimension_numbers = #tpu.dot_dimension_numbers<[1], [0], [0], [1], [0, 0, 1, 1], [], []>} : vector<2x32xf32>, vector<32x96xf32>, vector<2x96xf32> -> vector<2x96xf32>
    %171 = vector.extract_strided_slice %169 {offsets = [0, 0], sizes = [2, 64], strides = [1, 1]} : vector<2x96xf32> to vector<2x64xf32>
    %172 = vector.extract_strided_slice %170 {offsets = [0, 0], sizes = [2, 64], strides = [1, 1]} : vector<2x96xf32> to vector<2x64xf32>
    %173 = arith.addf %171, %172 : vector<2x64xf32>
    %174 = arith.negf %173 : vector<2x64xf32>
    %175 = math.exp %174 : vector<2x64xf32>
    %cst_35 = arith.constant 1.000000e+00 : f32
    %176 = vector.broadcast %cst_35 : f32 to vector<2x64xf32>
    %177 = arith.addf %176, %175 : vector<2x64xf32>
    %178 = arith.divf %176, %177 : vector<2x64xf32>
    %179 = vector.extract_strided_slice %178 {offsets = [0, 0], sizes = [2, 32], strides = [1, 1]} : vector<2x64xf32> to vector<2x32xf32>
    %180 = vector.extract_strided_slice %178 {offsets = [0, 32], sizes = [2, 32], strides = [1, 1]} : vector<2x64xf32> to vector<2x32xf32>
    %181 = vector.extract_strided_slice %169 {offsets = [0, 64], sizes = [2, 32], strides = [1, 1]} : vector<2x96xf32> to vector<2x32xf32>
    %182 = vector.extract_strided_slice %170 {offsets = [0, 64], sizes = [2, 32], strides = [1, 1]} : vector<2x96xf32> to vector<2x32xf32>
    %183 = arith.addf %182, %40 : vector<2x32xf32>
    %184 = arith.mulf %179, %183 : vector<2x32xf32>
    %185 = arith.addf %181, %184 : vector<2x32xf32>
    %186 = math.tanh %185 : vector<2x32xf32>
    %cst_36 = arith.constant 1.000000e+00 : f32
    %187 = vector.broadcast %cst_36 : f32 to vector<2x32xf32>
    %188 = arith.subf %187, %180 : vector<2x32xf32>
    %189 = arith.mulf %188, %186 : vector<2x32xf32>
    %190 = arith.mulf %180, %166 : vector<2x32xf32>
    %191 = arith.addf %189, %190 : vector<2x32xf32>
    %192 = arith.addf %167, %191 : vector<2x32xf32>
    %193 = vector.extract_strided_slice %36 {offsets = [0, 6, 0], sizes = [2, 1, 96], strides = [1, 1, 1]} : vector<2x8x96xf32> to vector<2x1x96xf32>
    %194 = vector.shape_cast %193 : vector<2x1x96xf32> to vector<2x96xf32>
    %cst_37 = arith.constant dense<0.000000e+00> : vector<2x96xf32>
    %195 = tpu.matmul %191, %37, %cst_37 {dimension_numbers = #tpu.dot_dimension_numbers<[1], [0], [0], [1], [0, 0, 1, 1], [], []>} : vector<2x32xf32>, vector<32x96xf32>, vector<2x96xf32> -> vector<2x96xf32>
    %196 = vector.extract_strided_slice %194 {offsets = [0, 0], sizes = [2, 64], strides = [1, 1]} : vector<2x96xf32> to vector<2x64xf32>
    %197 = vector.extract_strided_slice %195 {offsets = [0, 0], sizes = [2, 64], strides = [1, 1]} : vector<2x96xf32> to vector<2x64xf32>
    %198 = arith.addf %196, %197 : vector<2x64xf32>
    %199 = arith.negf %198 : vector<2x64xf32>
    %200 = math.exp %199 : vector<2x64xf32>
    %cst_38 = arith.constant 1.000000e+00 : f32
    %201 = vector.broadcast %cst_38 : f32 to vector<2x64xf32>
    %202 = arith.addf %201, %200 : vector<2x64xf32>
    %203 = arith.divf %201, %202 : vector<2x64xf32>
    %204 = vector.extract_strided_slice %203 {offsets = [0, 0], sizes = [2, 32], strides = [1, 1]} : vector<2x64xf32> to vector<2x32xf32>
    %205 = vector.extract_strided_slice %203 {offsets = [0, 32], sizes = [2, 32], strides = [1, 1]} : vector<2x64xf32> to vector<2x32xf32>
    %206 = vector.extract_strided_slice %194 {offsets = [0, 64], sizes = [2, 32], strides = [1, 1]} : vector<2x96xf32> to vector<2x32xf32>
    %207 = vector.extract_strided_slice %195 {offsets = [0, 64], sizes = [2, 32], strides = [1, 1]} : vector<2x96xf32> to vector<2x32xf32>
    %208 = arith.addf %207, %40 : vector<2x32xf32>
    %209 = arith.mulf %204, %208 : vector<2x32xf32>
    %210 = arith.addf %206, %209 : vector<2x32xf32>
    %211 = math.tanh %210 : vector<2x32xf32>
    %cst_39 = arith.constant 1.000000e+00 : f32
    %212 = vector.broadcast %cst_39 : f32 to vector<2x32xf32>
    %213 = arith.subf %212, %205 : vector<2x32xf32>
    %214 = arith.mulf %213, %211 : vector<2x32xf32>
    %215 = arith.mulf %205, %191 : vector<2x32xf32>
    %216 = arith.addf %214, %215 : vector<2x32xf32>
    %217 = arith.addf %192, %216 : vector<2x32xf32>
    %218 = vector.extract_strided_slice %36 {offsets = [0, 7, 0], sizes = [2, 1, 96], strides = [1, 1, 1]} : vector<2x8x96xf32> to vector<2x1x96xf32>
    %219 = vector.shape_cast %218 : vector<2x1x96xf32> to vector<2x96xf32>
    %cst_40 = arith.constant dense<0.000000e+00> : vector<2x96xf32>
    %220 = tpu.matmul %216, %37, %cst_40 {dimension_numbers = #tpu.dot_dimension_numbers<[1], [0], [0], [1], [0, 0, 1, 1], [], []>} : vector<2x32xf32>, vector<32x96xf32>, vector<2x96xf32> -> vector<2x96xf32>
    %221 = vector.extract_strided_slice %219 {offsets = [0, 0], sizes = [2, 64], strides = [1, 1]} : vector<2x96xf32> to vector<2x64xf32>
    %222 = vector.extract_strided_slice %220 {offsets = [0, 0], sizes = [2, 64], strides = [1, 1]} : vector<2x96xf32> to vector<2x64xf32>
    %223 = arith.addf %221, %222 : vector<2x64xf32>
    %224 = arith.negf %223 : vector<2x64xf32>
    %225 = math.exp %224 : vector<2x64xf32>
    %cst_41 = arith.constant 1.000000e+00 : f32
    %226 = vector.broadcast %cst_41 : f32 to vector<2x64xf32>
    %227 = arith.addf %226, %225 : vector<2x64xf32>
    %228 = arith.divf %226, %227 : vector<2x64xf32>
    %229 = vector.extract_strided_slice %228 {offsets = [0, 0], sizes = [2, 32], strides = [1, 1]} : vector<2x64xf32> to vector<2x32xf32>
    %230 = vector.extract_strided_slice %228 {offsets = [0, 32], sizes = [2, 32], strides = [1, 1]} : vector<2x64xf32> to vector<2x32xf32>
    %231 = vector.extract_strided_slice %219 {offsets = [0, 64], sizes = [2, 32], strides = [1, 1]} : vector<2x96xf32> to vector<2x32xf32>
    %232 = vector.extract_strided_slice %220 {offsets = [0, 64], sizes = [2, 32], strides = [1, 1]} : vector<2x96xf32> to vector<2x32xf32>
    %233 = arith.addf %232, %40 : vector<2x32xf32>
    %234 = arith.mulf %229, %233 : vector<2x32xf32>
    %235 = arith.addf %231, %234 : vector<2x32xf32>
    %236 = math.tanh %235 : vector<2x32xf32>
    %cst_42 = arith.constant 1.000000e+00 : f32
    %237 = vector.broadcast %cst_42 : f32 to vector<2x32xf32>
    %238 = arith.subf %237, %230 : vector<2x32xf32>
    %239 = arith.mulf %238, %236 : vector<2x32xf32>
    %240 = arith.mulf %230, %216 : vector<2x32xf32>
    %241 = arith.addf %239, %240 : vector<2x32xf32>
    %242 = arith.addf %217, %241 : vector<2x32xf32>
    %cst_43 = arith.constant 1.250000e-01 : f32
    %243 = vector.broadcast %cst_43 : f32 to vector<2x32xf32>
    %244 = arith.mulf %242, %243 : vector<2x32xf32>
    %c96 = arith.constant 96 : index
    %c0_44 = arith.constant 0 : index
    %245 = vector.load %arg1[%c96, %c0_44] : memref<160x128xf32, #tpu.memory_space<vmem>>, vector<32x4xf32>
    %c152 = arith.constant 152 : index
    %c0_45 = arith.constant 0 : index
    %246 = vector.load %arg1[%c152, %c0_45] : memref<160x128xf32, #tpu.memory_space<vmem>>, vector<1x4xf32>
    %cst_46 = arith.constant dense<0.000000e+00> : vector<2x4xf32>
    %247 = tpu.matmul %244, %245, %cst_46 {dimension_numbers = #tpu.dot_dimension_numbers<[1], [0], [0], [1], [0, 0, 1, 1], [], []>} : vector<2x32xf32>, vector<32x4xf32>, vector<2x4xf32> -> vector<2x4xf32>
    %248 = vector.broadcast %246 : vector<1x4xf32> to vector<2x4xf32>
    %249 = arith.addf %247, %248 : vector<2x4xf32>
    %cst_47 = arith.constant dense<0xFF800000> : vector<2xf32>
    %250 = vector.multi_reduction <maximumf>, %249, %cst_47 [1] : vector<2x4xf32> to vector<2xf32>
    %251 = vector.shape_cast %250 : vector<2xf32> to vector<2x1xf32>
    %252 = vector.broadcast %251 : vector<2x1xf32> to vector<2x4xf32>
    %253 = arith.subf %249, %252 : vector<2x4xf32>
    %254 = math.exp %253 : vector<2x4xf32>
    %cst_48 = arith.constant dense<0.000000e+00> : vector<2xf32>
    %255 = vector.multi_reduction <add>, %254, %cst_48 [1] : vector<2x4xf32> to vector<2xf32>
    %256 = vector.shape_cast %255 : vector<2xf32> to vector<2x1xf32>
    %257 = math.log %256 : vector<2x1xf32>
    %258 = arith.addf %251, %257 : vector<2x1xf32>
    %259 = vector.broadcast %258 : vector<2x1xf32> to vector<2x4xf32>
    %260 = arith.subf %249, %259 : vector<2x4xf32>
    %cst_49 = arith.constant 0.000000e+00 : f32
    %261 = vector.broadcast %cst_49 : f32 to vector<16x72xf32>
    %262 = tpu.concatenate %26, %1, %27, %261 in 1 : vector<16x32xf32>, vector<16x16xf32>, vector<16x8xf32>, vector<16x72xf32> -> vector<16x128xf32>
    %c0_50 = arith.constant 0 : index
    %c0_51 = arith.constant 0 : index
    %263 = vector.load %arg2[%c0_50, %c0_51] : memref<18x128xf32, #tpu.memory_space<vmem>>, vector<16x128xf32>
    tpu.vector_store %arg2[%c0_50, %c0_51], %262 {strides = array<i32>} : memref<18x128xf32, #tpu.memory_space<vmem>>, vector<16x128xf32>,
    %cst_52 = arith.constant 0.000000e+00 : f32
    %264 = vector.broadcast %cst_52 : f32 to vector<2x92xf32>
    %265 = tpu.concatenate %244, %260, %264 in 1 : vector<2x32xf32>, vector<2x4xf32>, vector<2x92xf32> -> vector<2x128xf32>
    %c16_53 = arith.constant 16 : index
    %c0_54 = arith.constant 0 : index
    %266 = vector.load %arg2[%c16_53, %c0_54] : memref<18x128xf32, #tpu.memory_space<vmem>>, vector<2x128xf32>
    tpu.vector_store %arg2[%c16_53, %c0_54], %265 {strides = array<i32>} : memref<18x128xf32, #tpu.memory_space<vmem>>, vector<2x128xf32>,
    return
  }
}

</mosaic_0001>

<bundles_post_ra>
// kernel: tpu_custom_call.1
= control target key start
LH: loop header
LB: loop body
LE: loop exit
PB: predicated region body
PF: predicated region fallthrough
CT: control target
= control target key end

     0   :  { %7 = vsyncpa [#allocation3], 0  ;;  %s1963_s0 = inlined_call_operand.hbm [shape: f32[2,8,16], index: 0, kind: input, shape index: {}]   ;;  %s1964_s1 = inlined_call_operand.hbm [shape: f32[160,128], index: 1, kind: input, shape index: {}]   ;;  %s1965_s2 = inlined_call_operand.hbm [shape: f32[18,128], index: 2, kind: output, shape index: {}]  }
   0x1   :  { %8 = vsyncpa [#allocation6], 0 }
   0x2   :  { %9 = vsyncpa [#allocation4], 0  ;;  %s14_s11 = sshll.u32 %s1963_s0, 4  ;;  %s1619_s12 = smov [#allocation2]   ;;  %s15_s11 = int_to_ptr.hbm [resolvable:$true] %s14_s11 }
   0x3   :  { %s16_s13 = sshll.u32 %s1619_s12, 4  ;;  %s27_s16 = sshll.u32 %s1964_s1, 4  ;;  %s17_s13 = int_to_ptr.vmem [resolvable:$true] %s16_s13  ;;  %s28_s16 = int_to_ptr.hbm [resolvable:$true] %s27_s16 }
   0x4   :  { %s1620_s17 = smov 128   ;;  %s1621_s18 = smov 8  }
   0x5   :  { %22 = dma.hbm_to_vmem [thread:$0]  %s15_s11, 256, %s17_s13, [#allocation3], %s1620_s17, %s1620_s17, %s1621_s18  }
   0x6   :  { %s1622_s19 = smov [#allocation5]  }
   0x7   :  { %s29_s20 = sshll.u32 %s1622_s19, 4  ;;  %s30_s20 = int_to_ptr.vmem [resolvable:$true] %s29_s20 }
   0x8   :  { %35 = dma.hbm_to_vmem [thread:$0]  %s28_s16, 2560, %s30_s20, [#allocation6], %s1620_s17, %s1620_s17, %s1621_s18  }
   0x9   :  { %1613 = dma.done.wait [#allocation3], 256  }
   0xa   :  { %1614 = vsyncadd [#allocation3], 4294967040 }
   0xb   :  { %1615 = dma.done.wait [#allocation6], 2560  }
   0xc   :  { %1616 = vsyncadd [#allocation6], 4294964736  ;;  %v47_v0 = vld [vmem:[#allocation5 + $0x8] sm:$0xff]  ;;  %v46_v1 = vld [vmem:[#allocation5] sm:$0xff]  ;;  %vm50_vm0 = vcmask 130048   ;;  %s1623_s0 = smov 96  }
   0xd   :  { %71 = vmatpush.msra.mxu0 %v47_v0  ;;  %v1656_v2 = vld [vmem:[#allocation2] sm:$0xff]  ;;  %v1660_v3 = vld [vmem:[#allocation2 + $0x8] sm:$0xff]  ;;  %v1427_v4 = vld [vmem:[#allocation5 + $0x80] ss:$0 sm:$0xff]  ;;  %s1624_s1 = smov 64   ;;  %vm85_vm1 = vcmask 261120  }
   0xe   :  { %vm139_vm2 = vcmask 64512   ;;  %v1679_v30 = vld [vmem:[#allocation5 + $0x58] sm:$0xff]  ;;  %v1682_v31 = vld [vmem:[#allocation5 + $0x50] sm:$0xff]  ;;  %v1685_v32 = vld [vmem:[#allocation5 + $0x48] sm:$0xff]  ;;  %v1625_v61 = vmov 0.0   ;;  %s1626_s21 = smov 32  }
   0xf   :  { %72 = vmatpush.msra.mxu0 %v46_v1  ;;  %v1688_v35 = vld [vmem:[#allocation5 + $0x40] sm:$0xff]  ;;  %v1428_v37 = vld [vmem:[#allocation5 + $0x90] ss:$0 sm:$0xff]  ;;  %v243_v38 = vld [vmem:[#allocation5 + $0x28] sm:$0xff]  ;;  %s1627_s22 = smov 48   ;;  %s1628_s23 = smov [#allocation7]  }
  0x10   :  { %1381 = vmatmul.msk.f32.vlgmr.msra.gmra.mxu0 %vm50_vm0, %v1656_v2  ;;  %v242_v39 = vld [vmem:[#allocation5 + $0x20] sm:$0xff]  ;;  %v241_v43 = vld [vmem:[#allocation5 + $0x18] sm:$0xff]  ;;  %v240_v62 = vld [vmem:[#allocation5 + $0x10] sm:$0xff]  ;;  %s1365_s24 = sshll.u32 %s1628_s23, 4  ;;  %s1367_s27 = sshll.u32 %s1965_s2, 4  ;;  %s1366_s24 = int_to_ptr.vmem [resolvable:$true] %s1365_s24  ;;  %s1368_s27 = int_to_ptr.hbm [resolvable:$true] %s1367_s27 }
  0x11   :  { %441 = vmatpush.msrb.mxu0 %v1679_v30  ;;  %v245_v63 = vld [vmem:[#allocation5 + $0x38] sm:$0xff]  ;;  %v244_v0 = vld [vmem:[#allocation5 + $0x30] sm:$0xff] }
  0x13   :  { %442 = vmatpush.msrb.mxu0 %v1682_v31 }
  0x15   :  { %443 = vmatpush.msrb.mxu0 %v1685_v32 }
  0x17   :  { %444 = vmatpush.msrb.mxu0 %v1688_v35 }
  0x18   :  { %1382 = vmatmul.msk.f32.gmra.mxu0 %vm50_vm0, %v1660_v3 }
  0x19   :  { %683 = vmatpush.msra.mxu0 %v1679_v30 }
  0x1b   :  { %684 = vmatpush.msra.mxu0 %v1682_v31 }
  0x1d   :  { %685 = vmatpush.msra.mxu0 %v1685_v32 }
  0x1f   :  { %686 = vmatpush.msra.mxu0 %v1688_v35 }
  0x8d   :  { %v74_v5 = vpop.f32.mrf.mxu0 }
  0x8e   :  { %v75_v6 = vadd.f32 %v1427_v4, %v74_v5 }
  0x90   :  { %83 = vrot.lane.b32.xlu0 %v75_v6, %s1623_s0  ;;  %v80_v10 = vmul.f32 0.31622776, %v75_v6 }
  0x95   :  { %v77_v7 = vpop.f32.mrf.mxu0 }
  0x96   :  { %v78_v8 = vadd.f32 %v1427_v4, %v77_v7 }
  0x98   :  { %112 = vrot.lane.b32.xlu0 %v78_v8, %s1623_s0  ;;  %v81_v12 = vmul.f32 0.31622776, %v78_v8 }
  0xa0   :  { %188 = vrot.lane.b32.xlu0 %v75_v6, %s1624_s1 }
 0x102   :  { %v84_v9 = vpop.permute.xlu0 %83 }
 0x103   :  { %1383 = vmatpush.xpose.msk.msra.mxu1 %vm85_vm1, %v84_v9 }
 0x106   :  { %1384 = vmatmul.msk.f32.vlgmr.msra.gmra.mxu1 %vm85_vm1, %v80_v10 }
 0x107   :  { %261 = vmatpush.msrb.mxu1 %v245_v63 }
 0x109   :  { %262 = vmatpush.msrb.mxu1 %v244_v0 }
 0x10a   :  { %v113_v11 = vpop.permute.xlu0 %112 }
 0x10b   :  { %1385 = vmatpush.xpose.msk.msra.mxu2 %vm85_vm1, %v113_v11  ;;  %806 = vmatpush.msra.mxu1 %v1679_v30 }
 0x10d   :  { %807 = vmatpush.msra.mxu1 %v1682_v31 }
 0x10e   :  { %1386 = vmatmul.msk.f32.vlgmr.msra.gmra.mxu2 %vm85_vm1, %v81_v12  ;;  %1389 = vmatmul.msk.f32.vlgmr.msrb.gmra.mxu1 %vm50_vm0, %v1656_v2 }
 0x10f   :  { %288 = vmatpush.msrb.mxu2 %v243_v38  ;;  %808 = vmatpush.msra.mxu1 %v1685_v32 }
 0x111   :  { %289 = vmatpush.msrb.mxu2 %v242_v39  ;;  %809 = vmatpush.msra.mxu1 %v1688_v35 }
 0x112   :  { %v189_v13 = vpop.permute.xlu0 %188 }
 0x113   :  { %209 = vmatpush.msra.mxu3 %v189_v13  ;;  %290 = vmatpush.msrb.mxu2 %v241_v43 }
 0x115   :  { %291 = vmatpush.msrb.mxu2 %v240_v62 }
 0x116   :  { %1390 = vmatmul.msk.f32.gmra.mxu1 %vm50_vm0, %v1660_v3 }
 0x117   :  { %929 = vmatpush.msra.mxu2 %v1679_v30 }
 0x119   :  { %930 = vmatpush.msra.mxu2 %v1682_v31 }
 0x11b   :  { %931 = vmatpush.msra.mxu2 %v1685_v32 }
 0x11d   :  { %932 = vmatpush.msra.mxu2 %v1688_v35 }
 0x183   :  { %v108_v14 = vpop.f32.mrf.mxu1 }
 0x184   :  { %v140_v15 = vsel %vm139_vm2, %v108_v14, -inf }
 0x185   :  { %141 = vmax.xlane.f32.xlu1 %v140_v15 }
 0x18b   :  { %v264_v3 = vpop.f32.mrf.mxu1 }
 0x191   :  { %v136_v16 = vpop.f32.mrf.mxu2 }
 0x192   :  { %v143_v17 = vsel %vm139_vm2, %v136_v16, -inf }
 0x193   :  { %144 = vmax.xlane.f32.xlu1 %v143_v17 }
 0x1ac   :  { %214 = vrot.lane.b32.xlu1 %v78_v8, %s1624_s1  ;;  %v1429_v8 = vld [vmem:[#allocation5 + $0x88] ss:$0 sm:$0xff] }
 0x1f8   :  { %v142_v18 = vpop.xlane.xlu1 %141 }
 0x1f9   :  { %v146_v19 = vsub.f32 %v108_v14, %v142_v18  ;;  %v267_v14 = vpop.f32.mrf.mxu1 }
 0x1fb   :  { %v148_v20 = vmul.f32 1.442695, %v146_v19 }
 0x1fd   :  { %1431 = vpow2.f32 %v148_v20 }
 0x203   :  { %v1432_v21 = vpop.eup %1431 }
 0x204   :  { %v152_v22 = vsel %vm139_vm2, %v1432_v21, 0.0 }
 0x205   :  { %153 = vadd.xlane.f32.xlu2 %v152_v22 }
 0x206   :  { %v145_v23 = vpop.xlane.xlu1 %144 }
 0x207   :  { %v147_v24 = vsub.f32 %v136_v16, %v145_v23 }
 0x209   :  { %v150_v25 = vmul.f32 1.442695, %v147_v24 }
 0x20b   :  { %1433 = vpow2.f32 %v150_v25 }
 0x211   :  { %v1675_v26 = vpop.eup %1433 }
 0x212   :  { %v155_v27 = vsel %vm139_vm2, %v1675_v26, 0.0 }
 0x213   :  { %156 = vadd.xlane.f32.xlu2 %v155_v27 }
 0x21e   :  { %v215_v28 = vpop.permute.xlu1 %214 }
 0x21f   :  { %235 = vmatpush.msrb.mxu3 %v215_v28 }
 0x22b   :  { %376 = vrot.lane.b32.xlu2 %v1428_v37, %s1624_s1 }
 0x278   :  { %v154_v29 = vpop.xlane.xlu2 %153 }
 0x279   :  { %1435 = vrcp.f32 %v154_v29  ;;  %v169_v40 = vand.u32 2147483648, %v154_v29  ;;  %v167_v42 = vand.u32 2147483647, %v154_v29  ;;  %vm163_vm4 = vweird.f32 %v154_v29 }
 0x27b   :  { %v170_v46 = vor.u32 1.1754944e-38, %v169_v40  ;;  %vm168_vm6 = vcmp.eq.f32.partialorder %v167_v42, 8.507059e+37 }
 0x27f   :  { %v1436_v33 = vpop.eup %1435 }
 0x280   :  { %v159_v34 = vmul.f32 %v1436_v33, %v154_v29  ;;  %vm164_vm3 = vweird.f32 %v1436_v33 }
 0x281   :  { %vm165_vm5 = vmor %vm163_vm4, %vm164_vm3  ;;  %vm423_vm4 = vcmask 1041409  }
 0x282   :  { %v160_v36 = vsub.f32 1.0, %v159_v34 }
 0x284   :  { %v161_v41 = vmul.f32 %v1436_v33, %v160_v36 }
 0x286   :  { %v157_v44 = vpop.xlane.xlu2 %156  ;;  %v162_v45 = vadd.f32 %v1436_v33, %v161_v41 }
 0x287   :  { %1437 = vrcp.f32 %v157_v44  ;;  %v184_v53 = vand.u32 2147483648, %v157_v44  ;;  %v182_v55 = vand.u32 2147483647, %v157_v44  ;;  %vm178_vm8 = vweird.f32 %v157_v44 }
 0x288   :  { %v166_v47 = vsel %vm165_vm5, %v1436_v33, %v162_v45 }
 0x289   :  { %v171_v48 = vsel %vm168_vm6, %v170_v46, %v166_v47  ;;  %v185_v57 = vor.u32 1.1754944e-38, %v184_v53  ;;  %vm183_vm10 = vcmp.eq.f32.partialorder %v182_v55, 8.507059e+37 }
 0x28a   :  { %v1696_v49 = vmul.f32 %v1432_v21, %v171_v48 }
 0x28c   :  { %1387 = vmatmul.msk.f32.vlgmr.msra.gmra.mxu3 %vm139_vm2, %v1696_v49 }
 0x28d   :  { %v1438_v50 = vpop.eup %1437  ;;  %323 = vmatpush.msra.mxu3 %v1679_v30 }
 0x28e   :  { %v174_v51 = vmul.f32 %v1438_v50, %v157_v44  ;;  %vm179_vm7 = vweird.f32 %v1438_v50  ;;  %v1737_v4 = vpop.permute.xlu2 %376 }
 0x28f   :  { %324 = vmatpush.msra.mxu3 %v1682_v31  ;;  %vm180_vm9 = vmor %vm178_vm8, %vm179_vm7 }
 0x290   :  { %v175_v52 = vsub.f32 1.0, %v174_v51 }
 0x291   :  { %325 = vmatpush.msra.mxu3 %v1685_v32 }
 0x292   :  { %v176_v54 = vmul.f32 %v1438_v50, %v175_v52 }
 0x293   :  { %326 = vmatpush.msra.mxu3 %v1688_v35 }
 0x294   :  { %v177_v56 = vadd.f32 %v1438_v50, %v176_v54 }
 0x296   :  { %v181_v58 = vsel %vm180_vm9, %v1438_v50, %v177_v56 }
 0x297   :  { %v186_v59 = vsel %vm183_vm10, %v185_v57, %v181_v58 }
 0x298   :  { %v1705_v60 = vmul.f32 %v1675_v26, %v186_v59 }
 0x29a   :  { %1388 = vmatmul.msk.f32.vlgmr.msrb.gmra.mxu3 %vm139_vm2, %v1705_v60 }
 0x29b   :  { %560 = vmatpush.msrb.mxu3 %v1679_v30 }
 0x29d   :  { %561 = vmatpush.msrb.mxu3 %v1682_v31 }
 0x29f   :  { %562 = vmatpush.msrb.mxu3 %v1685_v32 }
 0x2a1   :  { %563 = vmatpush.msrb.mxu3 %v1688_v35 }
 0x2a2   :  { %327 = vmatmul.f32.vlgmr.msra.gmra.mxu3 %v1625_v61 }
 0x2a3   :  { %1052 = vmatpush.msra.mxu3 %v1679_v30 }
 0x2a5   :  { %1053 = vmatpush.msra.mxu3 %v1682_v31 }
 0x2a7   :  { %1054 = vmatpush.msra.mxu3 %v1685_v32 }
 0x2a9   :  { %1055 = vmatpush.msra.mxu3 %v1688_v35 }
 0x30f   :  { %v1729_v1 = vpop.f32.mrf.mxu3 }
 0x310   :  { %1391 = vmatmul.msk.f32.vlgmr.msrb.gmra.mxu2 %vm85_vm1, %v1729_v1 }
 0x31d   :  { %v1733_v2 = vpop.f32.mrf.mxu3 }
 0x31e   :  { %1392 = vmatmul.msk.f32.gmra.mxu2 %vm85_vm1, %v1733_v2 }
 0x325   :  { %v328_v5 = vpop.f32.mrf.mxu3 }
 0x326   :  { %v379_v6 = vadd.f32 %v1737_v4, %v328_v5  ;;  %v332_v19 = vrot.slane %v328_v5, 1 }
 0x328   :  { %v381_v7 = vrot.slane %v379_v6, 1 }
 0x32a   :  { %384 = vrot.lane.b32.xlu0 %v381_v7, %s1624_s1 }
 0x332   :  { %382 = vrot.lane.b32.xlu0 %v379_v6, %s1624_s1 }
 0x393   :  { %v293_v9 = vpop.f32.mrf.mxu2 }
 0x394   :  { %v294_v10 = vadd.f32 %v293_v9, %v264_v3 }
 0x396   :  { %v1742_v11 = vadd.f32 %v1429_v8, %v294_v10 }
 0x398   :  { %v335_v12 = vadd.f32 %v328_v5, %v1742_v11 }
 0x39a   :  { %v1393_v13 = vmul.f32 -1.442695, %v335_v12 }
 0x39c   :  { %1439 = vpow2.f32 %v1393_v13  ;;  %v385_v23 = vpop.permute.xlu0 %384 }
 0x3a1   :  { %v296_v15 = vpop.f32.mrf.mxu2 }
 0x3a2   :  { %v1440_v16 = vpop.eup %1439  ;;  %v297_v17 = vadd.f32 %v296_v15, %v267_v14 }
 0x3a3   :  { %v343_v18 = vadd.f32 1.0, %v1440_v16 }
 0x3a4   :  { %v1745_v20 = vadd.f32 %v1429_v8, %v297_v17  ;;  %v383_v37 = vpop.permute.xlu0 %382 }
 0x3a5   :  { %1441 = vrcp.f32 %v343_v18  ;;  %v356_v27 = vand.u32 2147483648, %v343_v18  ;;  %v354_v33 = vand.u32 2147483647, %v343_v18  ;;  %vm350_vm12 = vweird.f32 %v343_v18 }
 0x3a6   :  { %v336_v21 = vadd.f32 %v332_v19, %v1745_v20 }
 0x3a7   :  { %v357_v38 = vor.u32 1.1754944e-38, %v356_v27  ;;  %vm355_vm14 = vcmp.eq.f32.partialorder %v354_v33, 8.507059e+37 }
 0x3a8   :  { %v1394_v22 = vmul.f32 -1.442695, %v336_v21 }
 0x3aa   :  { %1443 = vpow2.f32 %v1394_v22 }
 0x3ab   :  { %v1442_v24 = vpop.eup %1441 }
 0x3ac   :  { %v346_v25 = vmul.f32 %v1442_v24, %v343_v18  ;;  %vm351_vm11 = vweird.f32 %v1442_v24 }
 0x3ad   :  { %vm352_vm13 = vmor %vm350_vm12, %vm351_vm11 }
 0x3ae   :  { %v347_v26 = vsub.f32 1.0, %v346_v25 }
 0x3b0   :  { %v1444_v28 = vpop.eup %1443  ;;  %v348_v29 = vmul.f32 %v1442_v24, %v347_v26 }
 0x3b1   :  { %v344_v34 = vadd.f32 1.0, %v1444_v28 }
 0x3b2   :  { %v349_v36 = vadd.f32 %v1442_v24, %v348_v29 }
 0x3b3   :  { %1445 = vrcp.f32 %v344_v34  ;;  %v371_v45 = vand.u32 2147483648, %v344_v34  ;;  %v369_v47 = vand.u32 2147483647, %v344_v34  ;;  %vm365_vm0 = vweird.f32 %v344_v34 }
 0x3b4   :  { %v353_v39 = vsel %vm352_vm13, %v1442_v24, %v349_v36 }
 0x3b5   :  { %v358_v40 = vsel %vm355_vm14, %v357_v38, %v353_v39  ;;  %v372_v50 = vor.u32 1.1754944e-38, %v371_v45  ;;  %vm370_vm3 = vcmp.eq.f32.partialorder %v369_v47, 8.507059e+37 }
 0x3b6   :  { %v388_v41 = vmul.f32 %v383_v37, %v358_v40  ;;  %v402_v62 = vsub.f32 1.0, %v358_v40  ;;  %v414_v3 = vmul.f32 0.0, %v358_v40 }
 0x3b8   :  { %392 = vrot.lane.b32.xlu2 %v388_v41, %s1624_s1 }
 0x3b9   :  { %v1446_v42 = vpop.eup %1445 }
 0x3ba   :  { %v361_v43 = vmul.f32 %v1446_v42, %v344_v34  ;;  %vm366_vm15 = vweird.f32 %v1446_v42 }
 0x3bb   :  { %vm367_vm2 = vmor %vm365_vm0, %vm366_vm15 }
 0x3bc   :  { %v362_v44 = vsub.f32 1.0, %v361_v43 }
 0x3be   :  { %v363_v46 = vmul.f32 %v1446_v42, %v362_v44 }
 0x3c0   :  { %v364_v48 = vadd.f32 %v1446_v42, %v363_v46 }
 0x3c2   :  { %v368_v51 = vsel %vm367_vm2, %v1446_v42, %v364_v48 }
 0x3c3   :  { %v373_v52 = vsel %vm370_vm3, %v372_v50, %v368_v51 }
 0x3c4   :  { %v389_v53 = vmul.f32 %v385_v23, %v373_v52  ;;  %v403_v63 = vsub.f32 1.0, %v373_v52  ;;  %v415_v6 = vmul.f32 0.0, %v373_v52 }
 0x3c6   :  { %394 = vrot.lane.b32.xlu0 %v389_v53, %s1624_s1 }
 0x412   :  { %v393_v54 = vpop.permute.xlu2 %392 }
 0x413   :  { %v398_v55 = vadd.f32 %v393_v54, %v1742_v11 }
 0x415   :  { %1447 = vtanh.f32 %v398_v55 }
 0x41b   :  { %v1448_v56 = vpop.eup %1447 }
 0x41c   :  { %406 = vrot.lane.b32.xlu0 %v1448_v56, %s1623_s0 }
 0x438   :  { %v395_v57 = vpop.permute.xlu0 %394 }
 0x439   :  { %v399_v58 = vadd.f32 %v395_v57, %v1745_v20 }
 0x43b   :  { %1449 = vtanh.f32 %v399_v58 }
 0x441   :  { %v1450_v59 = vpop.eup %1449 }
 0x442   :  { %408 = vrot.lane.b32.xlu1 %v1450_v59, %s1623_s0 }
 0x48e   :  { %v407_v61 = vpop.permute.xlu0 %406 }
 0x48f   :  { %v412_v5 = vmul.f32 %v407_v61, %v402_v62 }
 0x491   :  { %v1756_v9 = vadd.f32 %v414_v3, %v412_v5 }
 0x493   :  { %v528_v62 = vrot.slane %v1756_v9, 7 }
 0x4b4   :  { %v409_v0 = vpop.permute.xlu1 %408 }
 0x4b5   :  { %v413_v7 = vmul.f32 %v409_v0, %v403_v63 }
 0x4b7   :  { %v1754_v8 = vadd.f32 %v415_v6, %v413_v7 }
 0x4b9   :  { %v422_v10 = vrot.slane %v1754_v8, 7 }
 0x4bb   :  { %v424_v12 = vsel %vm423_vm4, %v422_v10, %v1756_v9 }
 0x4bc   :  { %425 = vrot.lane.b32.xlu2 %v424_v12, %s1623_s0 }
 0x516   :  { %v426_v13 = vpop.permute.xlu2 %425 }
 0x517   :  { %1395 = vmatmul.msk.f32.vlgmr.msrb.gmra.mxu0 %vm85_vm1, %v426_v13 }
 0x518   :  { %1175 = vmatpush.msrb.mxu0 %v1679_v30 }
 0x51a   :  { %1176 = vmatpush.msrb.mxu0 %v1682_v31 }
 0x51c   :  { %1177 = vmatpush.msrb.mxu0 %v1685_v32 }
 0x51e   :  { %1178 = vmatpush.msrb.mxu0 %v1688_v35 }
 0x594   :  { %v446_v14 = vpop.f32.mrf.mxu0 }
 0x595   :  { %v493_v15 = vadd.f32 %v446_v14, %v1737_v4  ;;  %v450_v17 = vrot.slane %v446_v14, 7  ;;  %v454_v18 = vadd.f32 %v446_v14, %v1745_v20 }
 0x597   :  { %498 = vrot.lane.b32.xlu0 %v493_v15, %s1624_s1  ;;  %v495_v16 = vrot.slane %v493_v15, 7  ;;  %v453_v19 = vadd.f32 %v450_v17, %v1742_v11  ;;  %v1397_v30 = vmul.f32 -1.442695, %v454_v18 }
 0x599   :  { %496 = vrot.lane.b32.xlu1 %v495_v16, %s1624_s1  ;;  %v1396_v21 = vmul.f32 -1.442695, %v453_v19  ;;  %1451 = vpow2.f32 %v1397_v30 }
 0x59b   :  { %1453 = vpow2.f32 %v1396_v21 }
 0x59f   :  { %v1452_v31 = vpop.eup %1451 }
 0x5a0   :  { %v462_v35 = vadd.f32 1.0, %v1452_v31 }
 0x5a1   :  { %v1454_v32 = vpop.eup %1453 }
 0x5a2   :  { %v461_v22 = vadd.f32 1.0, %v1454_v32  ;;  %1455 = vrcp.f32 %v462_v35  ;;  %v489_v36 = vand.u32 2147483648, %v462_v35  ;;  %vm483_vm6 = vweird.f32 %v462_v35 }
 0x5a3   :  { %v487_v37 = vand.u32 2147483647, %v462_v35 }
 0x5a4   :  { %1457 = vrcp.f32 %v461_v22  ;;  %v474_v39 = vand.u32 2147483648, %v461_v22  ;;  %vm468_vm9 = vweird.f32 %v461_v22  ;;  %v472_v41 = vand.u32 2147483647, %v461_v22 }
 0x5a5   :  { %v490_v42 = vor.u32 1.1754944e-38, %v489_v36  ;;  %vm488_vm11 = vcmp.eq.f32.partialorder %v487_v37, 8.507059e+37 }
 0x5a6   :  { %v475_v46 = vor.u32 1.1754944e-38, %v474_v39  ;;  %vm473_vm12 = vcmp.eq.f32.partialorder %v472_v41, 8.507059e+37 }
 0x5a8   :  { %v1456_v23 = vpop.eup %1455 }
 0x5a9   :  { %v479_v25 = vmul.f32 %v1456_v23, %v462_v35  ;;  %vm484_vm5 = vweird.f32 %v1456_v23 }
 0x5aa   :  { %v1458_v24 = vpop.eup %1457  ;;  %vm485_vm8 = vmor %vm483_vm6, %vm484_vm5 }
 0x5ab   :  { %v464_v26 = vmul.f32 %v1458_v24, %v461_v22  ;;  %v480_v27 = vsub.f32 1.0, %v479_v25  ;;  %vm469_vm7 = vweird.f32 %v1458_v24 }
 0x5ac   :  { %vm470_vm10 = vmor %vm468_vm9, %vm469_vm7 }
 0x5ad   :  { %v465_v28 = vsub.f32 1.0, %v464_v26  ;;  %v481_v29 = vmul.f32 %v1456_v23, %v480_v27 }
 0x5af   :  { %v466_v33 = vmul.f32 %v1458_v24, %v465_v28  ;;  %v482_v34 = vadd.f32 %v1456_v23, %v481_v29 }
 0x5b1   :  { %v467_v38 = vadd.f32 %v1458_v24, %v466_v33  ;;  %v486_v40 = vsel %vm485_vm8, %v1456_v23, %v482_v34 }
 0x5b2   :  { %v491_v45 = vsel %vm488_vm11, %v490_v42, %v486_v40 }
 0x5b3   :  { %v471_v43 = vsel %vm470_vm10, %v1458_v24, %v467_v38  ;;  %v517_v59 = vsub.f32 1.0, %v491_v45  ;;  %v532_v7 = vmul.f32 %v491_v45, %v422_v10 }
 0x5b4   :  { %v476_v50 = vsel %vm473_vm12, %v475_v46, %v471_v43 }
 0x5b5   :  { %v516_v61 = vsub.f32 1.0, %v476_v50  ;;  %v531_v5 = vmul.f32 %v528_v62, %v476_v50 }
 0x609   :  { %v499_v44 = vpop.permute.xlu0 %498 }
 0x60a   :  { %v503_v47 = vmul.f32 %v499_v44, %v491_v45 }
 0x60b   :  { %v497_v48 = vpop.permute.xlu1 %496 }
 0x60c   :  { %v502_v51 = vmul.f32 %v497_v48, %v476_v50  ;;  %508 = vrot.lane.b32.xlu1 %v503_v47, %s1624_s1 }
 0x60e   :  { %506 = vrot.lane.b32.xlu2 %v502_v51, %s1624_s1 }
 0x668   :  { %v507_v52 = vpop.permute.xlu2 %506 }
 0x669   :  { %v512_v53 = vadd.f32 %v507_v52, %v1742_v11 }
 0x66b   :  { %1459 = vtanh.f32 %v512_v53 }
 0x671   :  { %v1460_v54 = vpop.eup %1459 }
 0x672   :  { %520 = vrot.lane.b32.xlu0 %v1460_v54, %s1623_s0 }
 0x67e   :  { %v509_v55 = vpop.permute.xlu1 %508 }
 0x67f   :  { %v513_v56 = vadd.f32 %v509_v55, %v1745_v20 }
 0x681   :  { %1461 = vtanh.f32 %v513_v56 }
 0x687   :  { %v1462_v57 = vpop.eup %1461 }
 0x688   :  { %522 = vrot.lane.b32.xlu2 %v1462_v57, %s1623_s0 }
 0x6e2   :  { %v523_v58 = vpop.permute.xlu2 %522 }
 0x6e3   :  { %v527_v0 = vmul.f32 %v523_v58, %v517_v59 }
 0x6e4   :  { %v521_v63 = vpop.permute.xlu0 %520 }
 0x6e5   :  { %v526_v6 = vmul.f32 %v521_v63, %v516_v61  ;;  %v1785_v12 = vadd.f32 %v532_v7, %v527_v0 }
 0x6e7   :  { %v1783_v3 = vadd.f32 %v531_v5, %v526_v6  ;;  %v650_v33 = vrot.slane %v1785_v12, 7  ;;  %v538_v7 = vrot.slane %v1785_v12, 1 }
 0x6e9   :  { %v537_v13 = vrot.slane %v1783_v3, 1  ;;  %v649_v0 = vrot.slane %v1783_v3, 7 }
 0x6eb   :  { %v543_v14 = vsel %vm423_vm4, %v1785_v12, %v537_v13 }
 0x6ec   :  { %544 = vrot.lane.b32.xlu1 %v543_v14, %s1623_s0 }
 0x75e   :  { %v545_v15 = vpop.permute.xlu1 %544 }
 0x75f   :  { %1398 = vmatmul.msk.f32.vlgmr.msrb.gmra.mxu3 %vm85_vm1, %v545_v15 }
 0x7e2   :  { %v565_v16 = vpop.f32.mrf.mxu3 }
 0x7e3   :  { %v570_v17 = vrot.slane %v565_v16, 7  ;;  %v613_v10 = vadd.f32 %v565_v16, %v1737_v4  ;;  %v569_v37 = vrot.slane %v565_v16, 6 }
 0x7e5   :  { %v574_v18 = vadd.f32 %v570_v17, %v1745_v20  ;;  %v616_v19 = vrot.slane %v613_v10, 7  ;;  %v615_v30 = vrot.slane %v613_v10, 6  ;;  %v573_v38 = vadd.f32 %v569_v37, %v1742_v11 }
 0x7e7   :  { %v1400_v21 = vmul.f32 -1.442695, %v574_v18  ;;  %619 = vrot.lane.b32.xlu2 %v616_v19, %s1624_s1  ;;  %617 = vrot.lane.b32.xlu0 %v615_v30, %s1624_s1  ;;  %v1399_v39 = vmul.f32 -1.442695, %v573_v38  ;;  %v542_v30 = vadd.f32 %v538_v7, %v1754_v8 }
 0x7e9   :  { %1463 = vpow2.f32 %v1400_v21  ;;  %v541_v21 = vadd.f32 %v537_v13, %v1756_v9 }
 0x7ef   :  { %v1464_v31 = vpop.eup %1463 }
 0x7f0   :  { %v582_v32 = vadd.f32 1.0, %v1464_v31 }
 0x7f2   :  { %1465 = vrcp.f32 %v582_v32  ;;  %v609_v24 = vand.u32 2147483648, %v582_v32  ;;  %v607_v26 = vand.u32 2147483647, %v582_v32  ;;  %vm603_vm14 = vweird.f32 %v582_v32 }
 0x7f3   :  { %1467 = vpow2.f32 %v1399_v39 }
 0x7f4   :  { %v610_v28 = vor.u32 1.1754944e-38, %v609_v24  ;;  %vm608_vm0 = vcmp.eq.f32.partialorder %v607_v26, 8.507059e+37 }
 0x7f8   :  { %v1466_v35 = vpop.eup %1465 }
 0x7f9   :  { %v599_v22 = vmul.f32 %v1466_v35, %v582_v32  ;;  %vm604_vm13 = vweird.f32 %v1466_v35  ;;  %v1468_v40 = vpop.eup %1467 }
 0x7fa   :  { %vm605_vm15 = vmor %vm603_vm14, %vm604_vm13  ;;  %v581_v41 = vadd.f32 1.0, %v1468_v40 }
 0x7fb   :  { %v600_v23 = vsub.f32 1.0, %v599_v22 }
 0x7fc   :  { %1469 = vrcp.f32 %v581_v41  ;;  %v594_v50 = vand.u32 2147483648, %v581_v41  ;;  %vm588_vm3 = vweird.f32 %v581_v41  ;;  %v592_v51 = vand.u32 2147483647, %v581_v41 }
 0x7fd   :  { %v601_v25 = vmul.f32 %v1466_v35, %v600_v23 }
 0x7fe   :  { %v595_v53 = vor.u32 1.1754944e-38, %v594_v50  ;;  %vm593_vm6 = vcmp.eq.f32.partialorder %v592_v51, 8.507059e+37 }
 0x7ff   :  { %v602_v27 = vadd.f32 %v1466_v35, %v601_v25 }
 0x801   :  { %v606_v29 = vsel %vm605_vm15, %v1466_v35, %v602_v27 }
 0x802   :  { %v611_v34 = vsel %vm608_vm0, %v610_v28, %v606_v29  ;;  %v1470_v44 = vpop.eup %1469 }
 0x803   :  { %v654_v36 = vmul.f32 %v650_v33, %v611_v34  ;;  %v584_v45 = vmul.f32 %v1470_v44, %v581_v41  ;;  %vm589_vm2 = vweird.f32 %v1470_v44  ;;  %v638_v6 = vsub.f32 1.0, %v611_v34 }
 0x804   :  { %vm590_vm5 = vmor %vm588_vm3, %vm589_vm2 }
 0x805   :  { %v585_v46 = vsub.f32 1.0, %v584_v45 }
 0x807   :  { %v586_v47 = vmul.f32 %v1470_v44, %v585_v46 }
 0x809   :  { %v587_v48 = vadd.f32 %v1470_v44, %v586_v47 }
 0x80b   :  { %v591_v52 = vsel %vm590_vm5, %v1470_v44, %v587_v48 }
 0x80c   :  { %v596_v55 = vsel %vm593_vm6, %v595_v53, %v591_v52 }
 0x80d   :  { %v637_v5 = vsub.f32 1.0, %v596_v55  ;;  %v653_v16 = vmul.f32 %v649_v0, %v596_v55 }
 0x841   :  { %v620_v42 = vpop.permute.xlu2 %619 }
 0x842   :  { %v624_v43 = vmul.f32 %v620_v42, %v611_v34 }
 0x844   :  { %629 = vrot.lane.b32.xlu0 %v624_v43, %s1624_s1 }
 0x859   :  { %v618_v54 = vpop.permute.xlu0 %617 }
 0x85a   :  { %v623_v56 = vmul.f32 %v618_v54, %v596_v55 }
 0x85c   :  { %627 = vrot.lane.b32.xlu1 %v623_v56, %s1624_s1 }
 0x8b6   :  { %v630_v57 = vpop.permute.xlu0 %629 }
 0x8b7   :  { %v634_v58 = vadd.f32 %v630_v57, %v1745_v20 }
 0x8b9   :  { %1471 = vtanh.f32 %v634_v58 }
 0x8bf   :  { %v1472_v59 = vpop.eup %1471 }
 0x8c0   :  { %643 = vrot.lane.b32.xlu1 %v1472_v59, %s1623_s0 }
 0x8ce   :  { %v628_v61 = vpop.permute.xlu1 %627 }
 0x8cf   :  { %v633_v62 = vadd.f32 %v628_v61, %v1742_v11 }
 0x8d1   :  { %1473 = vtanh.f32 %v633_v62 }
 0x8d7   :  { %v1474_v63 = vpop.eup %1473 }
 0x8d8   :  { %641 = vrot.lane.b32.xlu2 %v1474_v63, %s1623_s0 }
 0x932   :  { %v642_v14 = vpop.permute.xlu2 %641  ;;  %v644_v15 = vpop.permute.xlu1 %643 }
 0x933   :  { %v647_v17 = vmul.f32 %v642_v14, %v637_v5  ;;  %v648_v10 = vmul.f32 %v644_v15, %v638_v6 }
 0x935   :  { %v655_v18 = vadd.f32 %v653_v16, %v647_v17  ;;  %v1808_v19 = vadd.f32 %v654_v36, %v648_v10 }
 0x937   :  { %v659_v31 = vrot.slane %v655_v18, 2  ;;  %v660_v32 = vrot.slane %v1808_v19, 2  ;;  %v665_v35 = vrot.slane %v1808_v19, 1  ;;  %v772_v42 = vrot.slane %v655_v18, 7 }
 0x939   :  { %v1816_v12 = vadd.f32 %v659_v31, %v541_v21  ;;  %v1818_v22 = vadd.f32 %v660_v32, %v542_v30  ;;  %v666_v23 = vsel %vm423_vm4, %v665_v35, %v659_v31  ;;  %v773_v30 = vrot.slane %v1808_v19, 7 }
 0x93a   :  { %667 = vrot.lane.b32.xlu0 %v666_v23, %s1623_s0 }
 0x9ac   :  { %v668_v24 = vpop.permute.xlu0 %667 }
 0x9ad   :  { %1401 = vmatmul.msk.f32.vlgmr.msra.gmra.mxu0 %vm85_vm1, %v668_v24 }
 0xa2a   :  { %v688_v8 = vpop.f32.mrf.mxu0 }
 0xa2b   :  { %v692_v25 = vrot.slane %v688_v8, 5  ;;  %v736_v9 = vadd.f32 %v688_v8, %v1737_v4  ;;  %v693_v46 = vrot.slane %v688_v8, 6 }
 0xa2d   :  { %v696_v3 = vadd.f32 %v692_v25, %v1742_v11  ;;  %v739_v13 = vrot.slane %v736_v9, 6  ;;  %v738_v26 = vrot.slane %v736_v9, 5  ;;  %v697_v47 = vadd.f32 %v693_v46, %v1745_v20 }
 0xa2f   :  { %v1402_v27 = vmul.f32 -1.442695, %v696_v3  ;;  %742 = vrot.lane.b32.xlu1 %v739_v13, %s1624_s1  ;;  %740 = vrot.lane.b32.xlu2 %v738_v26, %s1624_s1  ;;  %v1403_v48 = vmul.f32 -1.442695, %v697_v47 }
 0xa31   :  { %1475 = vpow2.f32 %v1402_v27 }
 0xa37   :  { %v1476_v28 = vpop.eup %1475 }
 0xa38   :  { %v704_v29 = vadd.f32 1.0, %v1476_v28 }
 0xa3a   :  { %1477 = vrcp.f32 %v704_v29  ;;  %v717_v37 = vand.u32 2147483648, %v704_v29  ;;  %v715_v39 = vand.u32 2147483647, %v704_v29  ;;  %vm711_vm8 = vweird.f32 %v704_v29 }
 0xa3b   :  { %1479 = vpow2.f32 %v1403_v48 }
 0xa3c   :  { %v718_v41 = vor.u32 1.1754944e-38, %v717_v37  ;;  %vm716_vm10 = vcmp.eq.f32.partialorder %v715_v39, 8.507059e+37 }
 0xa40   :  { %v1478_v33 = vpop.eup %1477 }
 0xa41   :  { %v707_v34 = vmul.f32 %v1478_v33, %v704_v29  ;;  %vm712_vm7 = vweird.f32 %v1478_v33  ;;  %v1480_v50 = vpop.eup %1479 }
 0xa42   :  { %vm713_vm9 = vmor %vm711_vm8, %vm712_vm7  ;;  %v705_v51 = vadd.f32 1.0, %v1480_v50 }
 0xa43   :  { %v708_v36 = vsub.f32 1.0, %v707_v34 }
 0xa44   :  { %1481 = vrcp.f32 %v705_v51  ;;  %v732_v59 = vand.u32 2147483648, %v705_v51  ;;  %vm726_vm12 = vweird.f32 %v705_v51  ;;  %v730_v61 = vand.u32 2147483647, %v705_v51 }
 0xa45   :  { %v709_v38 = vmul.f32 %v1478_v33, %v708_v36 }
 0xa46   :  { %v733_v63 = vor.u32 1.1754944e-38, %v732_v59  ;;  %vm731_vm14 = vcmp.eq.f32.partialorder %v730_v61, 8.507059e+37 }
 0xa47   :  { %v710_v40 = vadd.f32 %v1478_v33, %v709_v38 }
 0xa49   :  { %v714_v43 = vsel %vm713_vm9, %v1478_v33, %v710_v40 }
 0xa4a   :  { %v719_v44 = vsel %vm716_vm10, %v718_v41, %v714_v43  ;;  %v1482_v54 = vpop.eup %1481 }
 0xa4b   :  { %v776_v45 = vmul.f32 %v772_v42, %v719_v44  ;;  %v722_v55 = vmul.f32 %v1482_v54, %v705_v51  ;;  %vm727_vm11 = vweird.f32 %v1482_v54  ;;  %v760_v21 = vsub.f32 1.0, %v719_v44 }
 0xa4c   :  { %vm728_vm13 = vmor %vm726_vm12, %vm727_vm11 }
 0xa4d   :  { %v723_v56 = vsub.f32 1.0, %v722_v55 }
 0xa4f   :  { %v724_v57 = vmul.f32 %v1482_v54, %v723_v56 }
 0xa51   :  { %v725_v58 = vadd.f32 %v1482_v54, %v724_v57 }
 0xa53   :  { %v729_v62 = vsel %vm728_vm13, %v1482_v54, %v725_v58 }
 0xa54   :  { %v734_v5 = vsel %vm731_vm14, %v733_v63, %v729_v62 }
 0xa55   :  { %v761_v18 = vsub.f32 1.0, %v734_v5  ;;  %v777_v35 = vmul.f32 %v773_v30, %v734_v5 }
 0xa89   :  { %v741_v52 = vpop.permute.xlu2 %740 }
 0xa8a   :  { %v746_v53 = vmul.f32 %v741_v52, %v719_v44 }
 0xa8c   :  { %750 = vrot.lane.b32.xlu0 %v746_v53, %s1624_s1 }
 0xaa1   :  { %v743_v0 = vpop.permute.xlu1 %742 }
 0xaa2   :  { %v747_v6 = vmul.f32 %v743_v0, %v734_v5 }
 0xaa4   :  { %752 = vrot.lane.b32.xlu2 %v747_v6, %s1624_s1 }
 0xafe   :  { %v753_v7 = vpop.permute.xlu2 %752  ;;  %v751_v14 = vpop.permute.xlu0 %750 }
 0xaff   :  { %v757_v15 = vadd.f32 %v753_v7, %v1745_v20  ;;  %v756_v16 = vadd.f32 %v751_v14, %v1742_v11 }
 0xb01   :  { %1483 = vtanh.f32 %v757_v15 }
 0xb02   :  { %1485 = vtanh.f32 %v756_v16 }
 0xb07   :  { %v1484_v17 = vpop.eup %1483 }
 0xb08   :  { %v1486_v10 = vpop.eup %1485  ;;  %766 = vrot.lane.b32.xlu0 %v1484_v17, %s1623_s0 }
 0xb09   :  { %764 = vrot.lane.b32.xlu1 %v1486_v10, %s1623_s0 }
 0xb7a   :  { %v767_v31 = vpop.permute.xlu0 %766 }
 0xb7b   :  { %v765_v32 = vpop.permute.xlu1 %764  ;;  %v771_v23 = vmul.f32 %v767_v31, %v761_v18 }
 0xb7c   :  { %v770_v24 = vmul.f32 %v765_v32, %v760_v21 }
 0xb7d   :  { %v1835_v8 = vadd.f32 %v777_v35, %v771_v23 }
 0xb7e   :  { %v1837_v25 = vadd.f32 %v776_v45, %v770_v24 }
 0xb7f   :  { %v783_v9 = vrot.slane %v1835_v8, 3  ;;  %v788_v3 = vrot.slane %v1835_v8, 2  ;;  %v896_v24 = vrot.slane %v1835_v8, 7 }
 0xb80   :  { %v782_v13 = vrot.slane %v1837_v25, 3  ;;  %v895_v32 = vrot.slane %v1837_v25, 7 }
 0xb81   :  { %v1843_v26 = vadd.f32 %v783_v9, %v1818_v22 }
 0xb82   :  { %v1846_v19 = vadd.f32 %v782_v13, %v1816_v12  ;;  %v789_v27 = vsel %vm423_vm4, %v788_v3, %v782_v13 }
 0xb83   :  { %790 = vrot.lane.b32.xlu2 %v789_v27, %s1623_s0 }
 0xbdd   :  { %v791_v28 = vpop.permute.xlu2 %790 }
 0xbde   :  { %1404 = vmatmul.msk.f32.vlgmr.msra.gmra.mxu1 %vm85_vm1, %v791_v28 }
 0xc5b   :  { %v811_v29 = vpop.f32.mrf.mxu1 }
 0xc5c   :  { %v859_v33 = vadd.f32 %v811_v29, %v1737_v4  ;;  %v815_v22 = vrot.slane %v811_v29, 4  ;;  %v816_v37 = vrot.slane %v811_v29, 5 }
 0xc5e   :  { %v862_v34 = vrot.slane %v859_v33, 5  ;;  %v861_v36 = vrot.slane %v859_v33, 4  ;;  %v819_v12 = vadd.f32 %v815_v22, %v1742_v11  ;;  %v820_v38 = vadd.f32 %v816_v37, %v1745_v20 }
 0xc60   :  { %865 = vrot.lane.b32.xlu0 %v862_v34, %s1624_s1  ;;  %863 = vrot.lane.b32.xlu1 %v861_v36, %s1624_s1  ;;  %v1405_v39 = vmul.f32 -1.442695, %v819_v12  ;;  %v1406_v40 = vmul.f32 -1.442695, %v820_v38 }
 0xc62   :  { %1487 = vpow2.f32 %v1405_v39 }
 0xc63   :  { %1489 = vpow2.f32 %v1406_v40 }
 0xc68   :  { %v1488_v41 = vpop.eup %1487 }
 0xc69   :  { %v1490_v42 = vpop.eup %1489  ;;  %v827_v43 = vadd.f32 1.0, %v1488_v41 }
 0xc6a   :  { %v828_v44 = vadd.f32 1.0, %v1490_v42 }
 0xc6b   :  { %1491 = vrcp.f32 %v827_v43  ;;  %vm834_vm2 = vweird.f32 %v827_v43  ;;  %v840_v57 = vand.u32 2147483648, %v827_v43  ;;  %v838_v59 = vand.u32 2147483647, %v827_v43 }
 0xc6c   :  { %1493 = vrcp.f32 %v828_v44  ;;  %v855_v56 = vand.u32 2147483648, %v828_v44  ;;  %vm849_vm3 = vweird.f32 %v828_v44  ;;  %v853_v58 = vand.u32 2147483647, %v828_v44 }
 0xc6d   :  { %v841_v0 = vor.u32 1.1754944e-38, %v840_v57  ;;  %vm839_vm8 = vcmp.eq.f32.partialorder %v838_v59, 8.507059e+37 }
 0xc6e   :  { %v856_v63 = vor.u32 1.1754944e-38, %v855_v56  ;;  %vm854_vm7 = vcmp.eq.f32.partialorder %v853_v58, 8.507059e+37 }
 0xc71   :  { %v1492_v45 = vpop.eup %1491 }
 0xc72   :  { %v1494_v46 = vpop.eup %1493  ;;  %v830_v48 = vmul.f32 %v1492_v45, %v827_v43  ;;  %vm835_vm15 = vweird.f32 %v1492_v45 }
 0xc73   :  { %v845_v47 = vmul.f32 %v1494_v46, %v828_v44  ;;  %vm850_vm0 = vweird.f32 %v1494_v46  ;;  %vm836_vm5 = vmor %vm834_vm2, %vm835_vm15 }
 0xc74   :  { %v831_v51 = vsub.f32 1.0, %v830_v48  ;;  %vm851_vm6 = vmor %vm849_vm3, %vm850_vm0 }
 0xc75   :  { %v846_v50 = vsub.f32 1.0, %v845_v47 }
 0xc76   :  { %v832_v53 = vmul.f32 %v1492_v45, %v831_v51 }
 0xc77   :  { %v847_v52 = vmul.f32 %v1494_v46, %v846_v50 }
 0xc78   :  { %v833_v55 = vadd.f32 %v1492_v45, %v832_v53 }
 0xc79   :  { %v848_v54 = vadd.f32 %v1494_v46, %v847_v52 }
 0xc7a   :  { %v837_v62 = vsel %vm836_vm5, %v1492_v45, %v833_v55 }
 0xc7b   :  { %v852_v61 = vsel %vm851_vm6, %v1494_v46, %v848_v54  ;;  %v842_v14 = vsel %vm839_vm8, %v841_v0, %v837_v62 }
 0xc7c   :  { %v857_v6 = vsel %vm854_vm7, %v856_v63, %v852_v61  ;;  %v883_v35 = vsub.f32 1.0, %v842_v14  ;;  %v899_v13 = vmul.f32 %v895_v32, %v842_v14 }
 0xc7d   :  { %v884_v23 = vsub.f32 1.0, %v857_v6  ;;  %v900_v28 = vmul.f32 %v896_v24, %v857_v6 }
 0xcd2   :  { %v866_v5 = vpop.permute.xlu0 %865  ;;  %v864_v7 = vpop.permute.xlu1 %863 }
 0xcd3   :  { %v870_v15 = vmul.f32 %v866_v5, %v857_v6  ;;  %v869_v16 = vmul.f32 %v864_v7, %v842_v14 }
 0xcd5   :  { %875 = vrot.lane.b32.xlu1 %v870_v15, %s1624_s1  ;;  %873 = vrot.lane.b32.xlu2 %v869_v16, %s1624_s1 }
 0xd2f   :  { %v874_v17 = vpop.permute.xlu2 %873 }
 0xd30   :  { %v879_v10 = vadd.f32 %v874_v17, %v1742_v11 }
 0xd32   :  { %1495 = vtanh.f32 %v879_v10 }
 0xd38   :  { %v1496_v18 = vpop.eup %1495 }
 0xd39   :  { %887 = vrot.lane.b32.xlu0 %v1496_v18, %s1623_s0 }
 0xd47   :  { %v876_v30 = vpop.permute.xlu1 %875 }
 0xd48   :  { %v880_v21 = vadd.f32 %v876_v30, %v1745_v20 }
 0xd4a   :  { %1497 = vtanh.f32 %v880_v21 }
 0xd50   :  { %v1498_v31 = vpop.eup %1497 }
 0xd51   :  { %889 = vrot.lane.b32.xlu2 %v1498_v31, %s1623_s0 }
 0xdab   :  { %v888_v9 = vpop.permute.xlu0 %887  ;;  %v890_v3 = vpop.permute.xlu2 %889 }
 0xdac   :  { %v893_v27 = vmul.f32 %v888_v9, %v883_v35  ;;  %v894_v29 = vmul.f32 %v890_v3, %v884_v23 }
 0xdae   :  { %v1864_v33 = vadd.f32 %v899_v13, %v893_v27  ;;  %v902_v34 = vadd.f32 %v900_v28, %v894_v29 }
 0xdb0   :  { %v905_v36 = vrot.slane %v1864_v33, 4  ;;  %v906_v22 = vrot.slane %v902_v34, 4  ;;  %v911_v37 = vrot.slane %v902_v34, 3  ;;  %v1019_v56 = vrot.slane %v902_v34, 7 }
 0xdb1   :  { %v1018_v28 = vrot.slane %v1864_v33, 7 }
 0xdb2   :  { %v1868_v12 = vadd.f32 %v905_v36, %v1846_v19  ;;  %v1871_v25 = vadd.f32 %v906_v22, %v1843_v26  ;;  %v912_v8 = vsel %vm423_vm4, %v911_v37, %v905_v36 }
 0xdb3   :  { %913 = vrot.lane.b32.xlu1 %v912_v8, %s1623_s0 }
 0xe25   :  { %v914_v38 = vpop.permute.xlu1 %913 }
 0xe26   :  { %1407 = vmatmul.msk.f32.vlgmr.msra.gmra.mxu2 %vm85_vm1, %v914_v38 }
 0xea9   :  { %v934_v39 = vpop.f32.mrf.mxu2 }
 0xeaa   :  { %v939_v40 = vrot.slane %v934_v39, 4  ;;  %v982_v41 = vadd.f32 %v934_v39, %v1737_v4  ;;  %v938_v59 = vrot.slane %v934_v39, 3 }
 0xeac   :  { %v943_v42 = vadd.f32 %v939_v40, %v1745_v20  ;;  %v984_v43 = vrot.slane %v982_v41, 3  ;;  %v985_v44 = vrot.slane %v982_v41, 4  ;;  %v942_v61 = vadd.f32 %v938_v59, %v1742_v11 }
 0xeae   :  { %v1409_v19 = vmul.f32 -1.442695, %v943_v42  ;;  %988 = vrot.lane.b32.xlu2 %v985_v44, %s1624_s1  ;;  %986 = vrot.lane.b32.xlu0 %v984_v43, %s1624_s1  ;;  %v1408_v62 = vmul.f32 -1.442695, %v942_v61 }
 0xeb0   :  { %1499 = vpow2.f32 %v1409_v19 }
 0xeb6   :  { %v1500_v26 = vpop.eup %1499 }
 0xeb7   :  { %v951_v45 = vadd.f32 1.0, %v1500_v26 }
 0xeb9   :  { %1501 = vrcp.f32 %v951_v45  ;;  %v978_v50 = vand.u32 2147483648, %v951_v45  ;;  %v976_v52 = vand.u32 2147483647, %v951_v45  ;;  %vm972_vm10 = vweird.f32 %v951_v45 }
 0xeba   :  { %1503 = vpow2.f32 %v1408_v62 }
 0xebb   :  { %v979_v54 = vor.u32 1.1754944e-38, %v978_v50  ;;  %vm977_vm12 = vcmp.eq.f32.partialorder %v976_v52, 8.507059e+37 }
 0xebf   :  { %v1502_v46 = vpop.eup %1501 }
 0xec0   :  { %v968_v47 = vmul.f32 %v1502_v46, %v951_v45  ;;  %vm973_vm9 = vweird.f32 %v1502_v46  ;;  %v1504_v63 = vpop.eup %1503 }
 0xec1   :  { %vm974_vm11 = vmor %vm972_vm10, %vm973_vm9  ;;  %v950_v0 = vadd.f32 1.0, %v1504_v63 }
 0xec2   :  { %v969_v48 = vsub.f32 1.0, %v968_v47 }
 0xec3   :  { %1505 = vrcp.f32 %v950_v0  ;;  %v963_v10 = vand.u32 2147483648, %v950_v0  ;;  %vm957_vm14 = vweird.f32 %v950_v0  ;;  %v961_v18 = vand.u32 2147483647, %v950_v0 }
 0xec4   :  { %v970_v51 = vmul.f32 %v1502_v46, %v969_v48 }
 0xec5   :  { %v964_v21 = vor.u32 1.1754944e-38, %v963_v10  ;;  %vm962_vm0 = vcmp.eq.f32.partialorder %v961_v18, 8.507059e+37 }
 0xec6   :  { %v971_v53 = vadd.f32 %v1502_v46, %v970_v51 }
 0xec8   :  { %v975_v55 = vsel %vm974_vm11, %v1502_v46, %v971_v53 }
 0xec9   :  { %v980_v57 = vsel %vm977_vm12, %v979_v54, %v975_v55  ;;  %v1506_v7 = vpop.eup %1505 }
 0xeca   :  { %v1023_v58 = vmul.f32 %v1019_v56, %v980_v57  ;;  %v953_v14 = vmul.f32 %v1506_v7, %v950_v0  ;;  %vm958_vm13 = vweird.f32 %v1506_v7  ;;  %v1007_v34 = vsub.f32 1.0, %v980_v57 }
 0xecb   :  { %vm959_vm15 = vmor %vm957_vm14, %vm958_vm13 }
 0xecc   :  { %v954_v15 = vsub.f32 1.0, %v953_v14 }
 0xece   :  { %v955_v16 = vmul.f32 %v1506_v7, %v954_v15 }
 0xed0   :  { %v956_v17 = vadd.f32 %v1506_v7, %v955_v16 }
 0xed2   :  { %v960_v30 = vsel %vm959_vm15, %v1506_v7, %v956_v17 }
 0xed3   :  { %v965_v32 = vsel %vm962_vm0, %v964_v21, %v960_v30 }
 0xed4   :  { %v1006_v29 = vsub.f32 1.0, %v965_v32  ;;  %v1022_v37 = vmul.f32 %v1018_v28, %v965_v32 }
 0xf08   :  { %v989_v5 = vpop.permute.xlu2 %988 }
 0xf09   :  { %v993_v6 = vmul.f32 %v989_v5, %v980_v57 }
 0xf0b   :  { %998 = vrot.lane.b32.xlu0 %v993_v6, %s1624_s1 }
 0xf20   :  { %v987_v31 = vpop.permute.xlu0 %986 }
 0xf21   :  { %v992_v35 = vmul.f32 %v987_v31, %v965_v32 }
 0xf23   :  { %996 = vrot.lane.b32.xlu1 %v992_v35, %s1624_s1 }
 0xf7d   :  { %v999_v23 = vpop.permute.xlu0 %998 }
 0xf7e   :  { %v1003_v24 = vadd.f32 %v999_v23, %v1745_v20 }
 0xf80   :  { %1507 = vtanh.f32 %v1003_v24 }
 0xf86   :  { %v1508_v9 = vpop.eup %1507 }
 0xf87   :  { %1012 = vrot.lane.b32.xlu1 %v1508_v9, %s1623_s0 }
 0xf95   :  { %v997_v3 = vpop.permute.xlu1 %996 }
 0xf96   :  { %v1002_v13 = vadd.f32 %v997_v3, %v1742_v11 }
 0xf98   :  { %1509 = vtanh.f32 %v1002_v13 }
 0xf9e   :  { %v1510_v27 = vpop.eup %1509 }
 0xf9f   :  { %1010 = vrot.lane.b32.xlu2 %v1510_v27, %s1623_s0 }
 0xff9   :  { %v1011_v36 = vpop.permute.xlu2 %1010  ;;  %v1013_v22 = vpop.permute.xlu1 %1012 }
 0xffa   :  { %v1016_v8 = vmul.f32 %v1011_v36, %v1006_v29  ;;  %v1017_v38 = vmul.f32 %v1013_v22, %v1007_v34 }
 0xffc   :  { %v1024_v39 = vadd.f32 %v1022_v37, %v1016_v8  ;;  %v1888_v40 = vadd.f32 %v1023_v58, %v1017_v38 }
 0xffe   :  { %v1028_v41 = vrot.slane %v1024_v39, 5  ;;  %v1029_v42 = vrot.slane %v1888_v40, 5  ;;  %v1034_v43 = vrot.slane %v1888_v40, 4  ;;  %v1141_v62 = vrot.slane %v1024_v39, 7 }
 0xfff   :  { %v1142_v38 = vrot.slane %v1888_v40, 7 }
0x1000   :  { %v1893_v44 = vadd.f32 %v1028_v41, %v1868_v12  ;;  %v1035_v33 = vsel %vm423_vm4, %v1034_v43, %v1028_v41  ;;  %v1897_v19 = vadd.f32 %v1029_v42, %v1871_v25 }
0x1001   :  { %1036 = vrot.lane.b32.xlu0 %v1035_v33, %s1623_s0 }
0x1073   :  { %v1037_v26 = vpop.permute.xlu0 %1036 }
0x1074   :  { %1410 = vmatmul.msk.f32.vlgmr.msra.gmra.mxu3 %vm85_vm1, %v1037_v26 }
0x10f7   :  { %v1057_v45 = vpop.f32.mrf.mxu3 }
0x10f8   :  { %v1061_v46 = vrot.slane %v1057_v45, 2  ;;  %v1105_v47 = vadd.f32 %v1057_v45, %v1737_v4  ;;  %v1062_v6 = vrot.slane %v1057_v45, 3 }
0x10fa   :  { %v1065_v48 = vadd.f32 %v1061_v46, %v1742_v11  ;;  %v1107_v50 = vrot.slane %v1105_v47, 2  ;;  %v1108_v51 = vrot.slane %v1105_v47, 3  ;;  %v1066_v7 = vadd.f32 %v1062_v6, %v1745_v20 }
0x10fc   :  { %v1411_v12 = vmul.f32 -1.442695, %v1065_v48  ;;  %1111 = vrot.lane.b32.xlu1 %v1108_v51, %s1624_s1  ;;  %1109 = vrot.lane.b32.xlu2 %v1107_v50, %s1624_s1  ;;  %v1412_v14 = vmul.f32 -1.442695, %v1066_v7 }
0x10fe   :  { %1511 = vpow2.f32 %v1411_v12 }
0x1104   :  { %v1512_v25 = vpop.eup %1511 }
0x1105   :  { %v1073_v52 = vadd.f32 1.0, %v1512_v25 }
0x1107   :  { %1513 = vrcp.f32 %v1073_v52  ;;  %v1086_v56 = vand.u32 2147483648, %v1073_v52  ;;  %v1084_v58 = vand.u32 2147483647, %v1073_v52  ;;  %vm1080_vm3 = vweird.f32 %v1073_v52 }
0x1108   :  { %1515 = vpow2.f32 %v1412_v14 }
0x1109   :  { %v1087_v61 = vor.u32 1.1754944e-38, %v1086_v56  ;;  %vm1085_vm6 = vcmp.eq.f32.partialorder %v1084_v58, 8.507059e+37 }
0x110d   :  { %v1514_v53 = vpop.eup %1513 }
0x110e   :  { %v1076_v54 = vmul.f32 %v1514_v53, %v1073_v52  ;;  %vm1081_vm2 = vweird.f32 %v1514_v53  ;;  %v1516_v15 = vpop.eup %1515 }
0x110f   :  { %vm1082_vm5 = vmor %vm1080_vm3, %vm1081_vm2  ;;  %v1074_v16 = vadd.f32 1.0, %v1516_v15 }
0x1110   :  { %v1077_v55 = vsub.f32 1.0, %v1076_v54 }
0x1111   :  { %1517 = vrcp.f32 %v1074_v16  ;;  %v1101_v35 = vand.u32 2147483648, %v1074_v16  ;;  %vm1095_vm8 = vweird.f32 %v1074_v16  ;;  %v1099_v23 = vand.u32 2147483647, %v1074_v16 }
0x1112   :  { %v1078_v57 = vmul.f32 %v1514_v53, %v1077_v55 }
0x1113   :  { %v1102_v9 = vor.u32 1.1754944e-38, %v1101_v35  ;;  %vm1100_vm10 = vcmp.eq.f32.partialorder %v1099_v23, 8.507059e+37 }
0x1114   :  { %v1079_v59 = vadd.f32 %v1514_v53, %v1078_v57 }
0x1116   :  { %v1083_v63 = vsel %vm1082_vm5, %v1514_v53, %v1079_v59  ;;  %vm1347_vm5 = vcmask 457728  }
0x1117   :  { %v1088_v0 = vsel %vm1085_vm6, %v1087_v61, %v1083_v63  ;;  %v1518_v18 = vpop.eup %1517  ;;  %vm1316_vm6 = vcmask 25600  }
0x1118   :  { %v1145_v5 = vmul.f32 %v1141_v62, %v1088_v0  ;;  %v1091_v30 = vmul.f32 %v1518_v18, %v1074_v16  ;;  %vm1096_vm7 = vweird.f32 %v1518_v18  ;;  %v1129_v39 = vsub.f32 1.0, %v1088_v0 }
0x1119   :  { %vm1097_vm9 = vmor %vm1095_vm8, %vm1096_vm7  ;;  %vm1358_vm7 = vcmask 293888  }
0x111a   :  { %v1092_v21 = vsub.f32 1.0, %v1091_v30 }
0x111c   :  { %v1093_v31 = vmul.f32 %v1518_v18, %v1092_v21 }
0x111e   :  { %v1094_v32 = vadd.f32 %v1518_v18, %v1093_v31 }
0x1120   :  { %v1098_v24 = vsel %vm1097_vm9, %v1518_v18, %v1094_v32 }
0x1121   :  { %v1103_v13 = vsel %vm1100_vm10, %v1102_v9, %v1098_v24 }
0x1122   :  { %v1130_v8 = vsub.f32 1.0, %v1103_v13  ;;  %v1146_v43 = vmul.f32 %v1142_v38, %v1103_v13 }
0x1156   :  { %v1110_v17 = vpop.permute.xlu2 %1109 }
0x1157   :  { %v1115_v10 = vmul.f32 %v1110_v17, %v1088_v0 }
0x1159   :  { %1119 = vrot.lane.b32.xlu0 %v1115_v10, %s1624_s1 }
0x116e   :  { %v1112_v3 = vpop.permute.xlu1 %1111 }
0x116f   :  { %v1116_v27 = vmul.f32 %v1112_v3, %v1103_v13 }
0x1171   :  { %1121 = vrot.lane.b32.xlu2 %v1116_v27, %s1624_s1 }
0x11cb   :  { %v1122_v28 = vpop.permute.xlu2 %1121  ;;  %v1120_v29 = vpop.permute.xlu0 %1119 }
0x11cc   :  { %v1126_v34 = vadd.f32 %v1122_v28, %v1745_v20  ;;  %v1125_v36 = vadd.f32 %v1120_v29, %v1742_v11 }
0x11ce   :  { %1519 = vtanh.f32 %v1126_v34 }
0x11cf   :  { %1521 = vtanh.f32 %v1125_v36 }
0x11d4   :  { %v1520_v22 = vpop.eup %1519 }
0x11d5   :  { %v1522_v37 = vpop.eup %1521  ;;  %1135 = vrot.lane.b32.xlu0 %v1520_v22, %s1623_s0 }
0x11d6   :  { %1133 = vrot.lane.b32.xlu1 %v1522_v37, %s1623_s0 }
0x1247   :  { %v1136_v41 = vpop.permute.xlu0 %1135 }
0x1248   :  { %v1134_v42 = vpop.permute.xlu1 %1133  ;;  %v1140_v33 = vmul.f32 %v1136_v41, %v1130_v8 }
0x1249   :  { %v1139_v26 = vmul.f32 %v1134_v42, %v1129_v39 }
0x124a   :  { %v1913_v45 = vadd.f32 %v1146_v43, %v1140_v33 }
0x124b   :  { %v1915_v46 = vadd.f32 %v1145_v5, %v1139_v26 }
0x124c   :  { %v1152_v47 = vrot.slane %v1913_v45, 6  ;;  %v1157_v48 = vrot.slane %v1913_v45, 5  ;;  %v1265_v43 = vrot.slane %v1913_v45, 7 }
0x124d   :  { %v1151_v50 = vrot.slane %v1915_v46, 6  ;;  %v1264_v41 = vrot.slane %v1915_v46, 7 }
0x124e   :  { %v1921_v51 = vadd.f32 %v1152_v47, %v1897_v19 }
0x124f   :  { %v1924_v40 = vadd.f32 %v1151_v50, %v1893_v44  ;;  %v1158_v12 = vsel %vm423_vm4, %v1157_v48, %v1151_v50 }
0x1250   :  { %1159 = vrot.lane.b32.xlu2 %v1158_v12, %s1623_s0 }
0x12aa   :  { %v1160_v25 = vpop.permute.xlu2 %1159 }
0x12ab   :  { %1413 = vmatmul.msk.f32.vlgmr.msrb.gmra.mxu0 %vm85_vm1, %v1160_v25 }
0x1328   :  { %v1180_v52 = vpop.f32.mrf.mxu0 }
0x1329   :  { %v1228_v53 = vadd.f32 %v1180_v52, %v1737_v4  ;;  %v1184_v19 = vrot.slane %v1180_v52, 1  ;;  %v1185_v56 = vrot.slane %v1180_v52, 2 }
0x132b   :  { %v1230_v54 = vrot.slane %v1228_v53, 1  ;;  %v1231_v55 = vrot.slane %v1228_v53, 2  ;;  %v1188_v44 = vadd.f32 %v1184_v19, %v1742_v11  ;;  %v1189_v57 = vadd.f32 %v1185_v56, %v1745_v20 }
0x132d   :  { %1234 = vrot.lane.b32.xlu1 %v1231_v55, %s1624_s1  ;;  %1232 = vrot.lane.b32.xlu0 %v1230_v54, %s1624_s1  ;;  %v1414_v58 = vmul.f32 -1.442695, %v1188_v44  ;;  %v1415_v59 = vmul.f32 -1.442695, %v1189_v57  ;;  %v1285_v44 = vld [vmem:[#allocation5 + $0x78] sm:$0xff]  ;;  %v1284_v57 = vld [vmem:[#allocation5 + $0x70] sm:$0xff] }
0x132e   :  { %1308 = vmatpush.msrb.mxu1 %v1285_v44 }
0x132f   :  { %1523 = vpow2.f32 %v1414_v58  ;;  %v1283_v58 = vld [vmem:[#allocation5 + $0x68] sm:$0xff] }
0x1330   :  { %1525 = vpow2.f32 %v1415_v59  ;;  %1309 = vmatpush.msrb.mxu1 %v1284_v57  ;;  %v1282_v59 = vld [vmem:[#allocation5 + $0x60] sm:$0xff] }
0x1332   :  { %1310 = vmatpush.msrb.mxu1 %v1283_v58 }
0x1334   :  { %1311 = vmatpush.msrb.mxu1 %v1282_v59 }
0x1335   :  { %v1524_v61 = vpop.eup %1523 }
0x1336   :  { %v1526_v62 = vpop.eup %1525  ;;  %v1196_v63 = vadd.f32 1.0, %v1524_v61  ;;  %v1539_v61 = vld [vmem:[#allocation2] sm:$0xff] }
0x1337   :  { %v1197_v4 = vadd.f32 1.0, %v1526_v62 }
0x1338   :  { %1527 = vrcp.f32 %v1196_v63  ;;  %vm1203_vm13 = vweird.f32 %v1196_v63  ;;  %v1209_v21 = vand.u32 2147483648, %v1196_v63  ;;  %v1207_v32 = vand.u32 2147483647, %v1196_v63 }
0x1339   :  { %1529 = vrcp.f32 %v1197_v4  ;;  %v1224_v30 = vand.u32 2147483648, %v1197_v4  ;;  %vm1218_vm14 = vweird.f32 %v1197_v4  ;;  %v1222_v31 = vand.u32 2147483647, %v1197_v4 }
0x133a   :  { %v1210_v9 = vor.u32 1.1754944e-38, %v1209_v21  ;;  %vm1208_vm3 = vcmp.eq.f32.partialorder %v1207_v32, 8.507059e+37 }
0x133b   :  { %v1225_v24 = vor.u32 1.1754944e-38, %v1224_v30  ;;  %vm1223_vm2 = vcmp.eq.f32.partialorder %v1222_v31, 8.507059e+37 }
0x133e   :  { %v1528_v0 = vpop.eup %1527 }
0x133f   :  { %v1530_v5 = vpop.eup %1529  ;;  %v1199_v7 = vmul.f32 %v1528_v0, %v1196_v63  ;;  %vm1204_vm11 = vweird.f32 %v1528_v0 }
0x1340   :  { %v1214_v6 = vmul.f32 %v1530_v5, %v1197_v4  ;;  %vm1219_vm12 = vweird.f32 %v1530_v5  ;;  %vm1205_vm15 = vmor %vm1203_vm13, %vm1204_vm11 }
0x1341   :  { %v1200_v15 = vsub.f32 1.0, %v1199_v7  ;;  %vm1220_vm0 = vmor %vm1218_vm14, %vm1219_vm12 }
0x1342   :  { %v1215_v14 = vsub.f32 1.0, %v1214_v6 }
0x1343   :  { %v1201_v17 = vmul.f32 %v1528_v0, %v1200_v15  ;;  %v1430_v15 = vld [vmem:[#allocation5 + $0x98] ss:$0 sm:$0xff] }
0x1344   :  { %v1216_v16 = vmul.f32 %v1530_v5, %v1215_v14 }
0x1345   :  { %v1202_v18 = vadd.f32 %v1528_v0, %v1201_v17 }
0x1346   :  { %v1217_v10 = vadd.f32 %v1530_v5, %v1216_v16 }
0x1347   :  { %v1206_v23 = vsel %vm1205_vm15, %v1528_v0, %v1202_v18 }
0x1348   :  { %v1221_v35 = vsel %vm1220_vm0, %v1530_v5, %v1217_v10  ;;  %v1211_v28 = vsel %vm1208_vm3, %v1210_v9, %v1206_v23 }
0x1349   :  { %v1226_v13 = vsel %vm1223_vm2, %v1225_v24, %v1221_v35  ;;  %v1252_v33 = vsub.f32 1.0, %v1211_v28  ;;  %v1268_v50 = vmul.f32 %v1264_v41, %v1211_v28 }
0x134a   :  { %v1253_v42 = vsub.f32 1.0, %v1226_v13 }
0x139f   :  { %v1235_v3 = vpop.permute.xlu1 %1234  ;;  %v1233_v27 = vpop.permute.xlu0 %1232 }
0x13a0   :  { %v1239_v29 = vmul.f32 %v1235_v3, %v1226_v13  ;;  %v1238_v34 = vmul.f32 %v1233_v27, %v1211_v28 }
0x13a2   :  { %1244 = vrot.lane.b32.xlu2 %v1239_v29, %s1624_s1  ;;  %1242 = vrot.lane.b32.xlu1 %v1238_v34, %s1624_s1 }
0x13fc   :  { %v1245_v36 = vpop.permute.xlu2 %1244 }
0x13fd   :  { %v1249_v22 = vadd.f32 %v1245_v36, %v1745_v20  ;;  %v1269_v20 = vmul.f32 %v1265_v43, %v1226_v13 }
0x13ff   :  { %1531 = vtanh.f32 %v1249_v22 }
0x1405   :  { %v1532_v37 = vpop.eup %1531 }
0x1406   :  { %1258 = vrot.lane.b32.xlu0 %v1532_v37, %s1623_s0 }
0x1414   :  { %v1243_v8 = vpop.permute.xlu1 %1242 }
0x1415   :  { %v1248_v38 = vadd.f32 %v1243_v8, %v1742_v11 }
0x1417   :  { %1533 = vtanh.f32 %v1248_v38 }
0x141d   :  { %v1534_v39 = vpop.eup %1533 }
0x141e   :  { %1256 = vrot.lane.b32.xlu2 %v1534_v39, %s1623_s0 }
0x1478   :  { %v1259_v26 = vpop.permute.xlu0 %1258  ;;  %v1257_v47 = vpop.permute.xlu2 %1256 }
0x1479   :  { %v1263_v48 = vmul.f32 %v1259_v26, %v1253_v42  ;;  %v1262_v12 = vmul.f32 %v1257_v47, %v1252_v33 }
0x147b   :  { %v1271_v25 = vadd.f32 %v1269_v20, %v1263_v48  ;;  %v1270_v52 = vadd.f32 %v1268_v50, %v1262_v12 }
0x147d   :  { %v1275_v53 = vrot.slane %v1271_v25, 7  ;;  %v1274_v11 = vrot.slane %v1270_v52, 7 }
0x147f   :  { %v1279_v54 = vadd.f32 %v1275_v53, %v1921_v51  ;;  %v1278_v55 = vadd.f32 %v1274_v11, %v1924_v40  ;;  %v1540_v51 = vld [vmem:[#allocation2 + $0x8] sm:$0xff] }
0x1481   :  { %v1281_v19 = vmul.f32 0.125, %v1279_v54  ;;  %v1280_v56 = vmul.f32 0.125, %v1278_v55 }
0x1483   :  { %v1290_v46 = vrot.slane %v1281_v19, 7 }
0x1485   :  { %v1291_v45 = vsel %vm423_vm4, %v1290_v46, %v1280_v56  ;;  %vm1344_vm4 = vcmask 392192  }
0x1486   :  { %1292 = vrot.lane.b32.xlu1 %v1291_v45, %s1623_s0 }
0x148e   :  { %1330 = vrot.lane.b32.xlu1 %v1539_v61, %s1626_s21 }
0x1496   :  { %1332 = vrot.lane.b32.xlu1 %v1540_v51, %s1626_s21 }
0x149e   :  { %1336 = vrot.lane.b32.xlu1 %v1696_v49, %s1627_s22 }
0x14a6   :  { %1338 = vrot.lane.b32.xlu1 %v1705_v60, %s1627_s22 }
0x14f8   :  { %v1293_v40 = vpop.permute.xlu1 %1292 }
0x14f9   :  { %1416 = vmatmul.msk.f32.vlgmr.msrb.gmra.mxu1 %vm85_vm1, %v1293_v40 }
0x1500   :  { %v1331_v62 = vpop.permute.xlu1 %1330 }
0x1501   :  { %v1342_v4 = vsel %vm85_vm1, %v1729_v1, %v1331_v62 }
0x1508   :  { %v1333_v63 = vpop.permute.xlu1 %1332 }
0x1509   :  { %v1343_v7 = vsel %vm85_vm1, %v1733_v2, %v1333_v63 }
0x1510   :  { %v1337_v0 = vpop.permute.xlu1 %1336 }
0x1511   :  { %v1345_v5 = vsel %vm1344_vm4, %v1342_v4, %v1337_v0 }
0x1512   :  { %v1348_v6 = vsel %vm1347_vm5, %v1345_v5, 0.0 }
0x1513   :  { %1350 = vst [vmem:[#allocation7] sm:$0xff] %v1348_v6 }
0x1518   :  { %v1339_v49 = vpop.permute.xlu1 %1338 }
0x1519   :  { %v1346_v14 = vsel %vm1344_vm4, %v1343_v7, %v1339_v49 }
0x151a   :  { %v1349_v60 = vsel %vm1347_vm5, %v1346_v14, 0.0 }
0x151b   :  { %1351 = vst [vmem:[#allocation7 + $0x8] sm:$0xff] %v1349_v60 }
0x1576   :  { %v1313_v16 = vpop.f32.mrf.mxu1 }
0x1577   :  { %v1314_v17 = vadd.f32 %v1430_v15, %v1313_v16 }
0x1579   :  { %v1317_v10 = vsel %vm1316_vm6, %v1314_v17, -inf }
0x157a   :  { %1318 = vmax.xlane.f32.xlu0 %v1317_v10 }
0x15ed   :  { %v1319_v18 = vpop.xlane.xlu0 %1318 }
0x15ee   :  { %v1320_v30 = vsub.f32 %v1314_v17, %v1319_v18 }
0x15f0   :  { %v1321_v1 = vmul.f32 1.442695, %v1320_v30 }
0x15f2   :  { %1535 = vpow2.f32 %v1321_v1 }
0x15f8   :  { %v1536_v21 = vpop.eup %1535 }
0x15f9   :  { %v1323_v31 = vsel %vm1316_vm6, %v1536_v21, 0.0 }
0x15fa   :  { %1324 = vadd.xlane.f32.xlu2 %v1323_v31 }
0x166d   :  { %v1325_v32 = vpop.xlane.xlu2 %1324 }
0x166e   :  { %1537 = vlog2.f32 %v1325_v32 }
0x1674   :  { %v1538_v2 = vpop.eup %1537 }
0x1675   :  { %v1327_v35 = vmul.f32 0.6931472, %v1538_v2 }
0x1677   :  { %v1328_v23 = vadd.f32 %v1327_v35, %v1319_v18 }
0x1679   :  { %v1329_v24 = vsub.f32 %v1314_v17, %v1328_v23 }
0x167b   :  { %1354 = vrot.lane.b32.xlu1 %v1329_v24, %s1626_s21 }
0x16ed   :  { %v1355_v9 = vpop.permute.xlu1 %1354 }
0x16ee   :  { %v1357_v3 = vsel %vm85_vm1, %v1293_v40, %v1355_v9 }
0x16ef   :  { %v1359_v13 = vsel %vm1358_vm7, %v1357_v3, 0.0 }
0x16f0   :  { %1360 = vst [vmem:[#allocation7 + $0x10] sm:$0x3] %v1359_v13 }
0x16f1   :  { %1373 = dma.vmem_to_hbm [thread:$0]  %s1366_s24, 384, %s1368_s27, [#allocation4], %s1620_s17, %s1620_s17, %s1621_s18  }
0x16f2   :  { %1617 = dma.done.wait [#allocation4], 384  }
0x16f3   :  { %1618 = vsyncadd [#allocation4], 4294966912 }
0x16f4   :  { %1378 = vsyncpa [#allocation3], 1 }
0x16f5   :  { %1379 = vsyncpa [#allocation6], 1 }
0x16f6   :  { %1380 = vsyncpa [#allocation4], 1 }

</bundles_post_ra>
